<compile_context>
chip_gen: v6e
topology: v6e:2x2x1
jax: 0.10.0
libtpu: 0.0.40
codegen_flags: <defaults>
</compile_context>

<pallas_src>
import jax
import jax.numpy as jnp
from jax.experimental import pallas as pl
from jax.experimental.pallas import tpu as pltpu

EPS = 1e-5  # nn.LayerNorm default

_INV_SQRT2 = 0.7071067811865476  # 1/sqrt(2), trace-time constant


def _gelu(x):
    # nn.GELU() default = exact erf-based GELU.
    return 0.5 * x * (1.0 + jax.lax.erf(x * _INV_SQRT2))


def _layernorm(x, gamma, beta):
    # Single-pass: mean and mean-of-squares in one sweep, var = E[x^2] - mu^2.
    mu = jnp.mean(x, axis=-1, keepdims=True)
    ms = jnp.mean(x * x, axis=-1, keepdims=True)
    var = jnp.maximum(ms - mu * mu, 0.0)
    return (x - mu) * jax.lax.rsqrt(var + EPS) * gamma + beta


def mlp_block_kernel(x_ref,
                     w1_ref, b1_ref, g1_ref, be1_ref,
                     w2_ref, b2_ref, g2_ref, be2_ref,
                     w3_ref, b3_ref, g3_ref, be3_ref,
                     w4_ref, b4_ref,
                     out_ref):
    # fc1 -> GELU -> LayerNorm(1024)   (dropout1 = identity in eval)
    h = jnp.dot(x_ref[...].astype(jnp.bfloat16), w1_ref[...],
                preferred_element_type=jnp.float32) + b1_ref[...]
    h = _layernorm(_gelu(h), g1_ref[...], be1_ref[...])

    # fc2 -> GELU -> LayerNorm(512)    (dropout2 = identity in eval)
    h = jnp.dot(h.astype(jnp.bfloat16), w2_ref[...],
                preferred_element_type=jnp.float32) + b2_ref[...]
    h = _layernorm(_gelu(h), g2_ref[...], be2_ref[...])

    # fc3 -> GELU -> LayerNorm(256)
    h = jnp.dot(h.astype(jnp.bfloat16), w3_ref[...],
                preferred_element_type=jnp.float32) + b3_ref[...]
    h = _layernorm(_gelu(h), g3_ref[...], be3_ref[...])

    # fc_out (output width padded to a lane-dense multiple of 128)
    out = jnp.dot(h.astype(jnp.bfloat16), w4_ref[...],
                  preferred_element_type=jnp.float32) + b4_ref[...]
    out_ref[...] = out.astype(out_ref.dtype)


def mlp_block_pallas(x, params, *, block_b=None):
    """x: (B, embed_size) f32.  params: dict of weights (in,out), biases/LN (1,N)."""
    B, E = x.shape
    V = params["w4"].shape[1]
    Vp = 128 * pl.cdiv(V, 128)  # lane-dense output width

    if block_b is None:
        # Multiple of 8, big enough to amortize per-step overhead (~0.35us),
        # small enough to bound VMEM and give >=2 grid steps for large B.
        block_b = B if B <= 512 else 512
    grid = (pl.cdiv(B, block_b),)

    # Cast matmul weights to bf16 (MXU-native); keep biases and LayerNorm
    # params in f32 (added / applied in f32 after accumulation).
    w1 = params["w1"].astype(jnp.bfloat16)
    w2 = params["w2"].astype(jnp.bfloat16)
    w3 = params["w3"].astype(jnp.bfloat16)
    w4 = params["w4"].astype(jnp.bfloat16)
    b4 = params["b4"]
    if Vp != V:
        w4 = jnp.pad(w4, ((0, 0), (0, Vp - V)))
        b4 = jnp.pad(b4, ((0, 0), (0, Vp - V)))

    param_vals = [
        w1, params["b1"], params["g1"], params["be1"],
        w2, params["b2"], params["g2"], params["be2"],
        w3, params["b3"], params["g3"], params["be3"],
        w4, b4,
    ]

    def full_spec(arr):
        # Constant block index -> fetched once, stays resident across the grid.
        return pl.BlockSpec(arr.shape, lambda i: (0, 0))

    in_specs = [pl.BlockSpec((block_b, E), lambda i: (i, 0))]
    in_specs += [full_spec(p) for p in param_vals]

    out = pl.pallas_call(
        mlp_block_kernel,
        out_shape=jax.ShapeDtypeStruct((B, Vp), x.dtype),
        grid_spec=pltpu.PrefetchScalarGridSpec(
            num_scalar_prefetch=0,
            grid=grid,
            in_specs=in_specs,
            out_specs=pl.BlockSpec((block_b, Vp), lambda i: (i, 0)),
        ),
        compiler_params=pltpu.CompilerParams(
            dimension_semantics=("parallel",),
            vmem_limit_bytes=56 << 20,  # headroom under v7x's 64 MiB physical
        ),
    )(x, *param_vals)

    return out[:, :V] if Vp != V else out


def init_params(key, embed_size, ans_vocab_size):
    dims = [(embed_size, 1024), (1024, 512), (512, 256), (256, ans_vocab_size)]
    params = {}
    keys = jax.random.split(key, 8)
    for idx, (din, dout) in enumerate(dims, start=1):
        kw, kb = keys[2 * (idx - 1)], keys[2 * (idx - 1) + 1]
        bound = 1.0 / jnp.sqrt(din)
        # stored pre-transposed: (in, out)
        params[f"w{idx}"] = jax.random.uniform(kw, (din, dout), jnp.float32,
                                               -bound, bound)
        params[f"b{idx}"] = jax.random.uniform(kb, (1, dout), jnp.float32,
                                               -bound, bound)
    # LayerNorm affine params (default init: gamma=1, beta=0)
    for idx, d in enumerate((1024, 512, 256), start=1):
        params[f"g{idx}"] = jnp.ones((1, d), jnp.float32)
        params[f"be{idx}"] = jnp.zeros((1, d), jnp.float32)
    return params


def mlp_block_ref(x, p):
    # Pure-JAX reference using the same bf16-input / f32-accumulate matmuls.
    def dot(a, w):
        return jnp.dot(a.astype(jnp.bfloat16), w.astype(jnp.bfloat16),
                       preferred_element_type=jnp.float32)

    h = dot(x, p["w1"]) + p["b1"]
    h = _layernorm(_gelu(h), p["g1"], p["be1"])
    h = dot(h, p["w2"]) + p["b2"]
    h = _layernorm(_gelu(h), p["g2"], p["be2"])
    h = dot(h, p["w3"]) + p["b3"]
    h = _layernorm(_gelu(h), p["g3"], p["be3"])
    return dot(h, p["w4"]) + p["b4"]


if __name__ == "__main__":
    embed_size = 32
    ans_vocab_size = 16
    batch = 8

    key = jax.random.PRNGKey(0)
    kx, kp = jax.random.split(key)
    x = jax.random.normal(kx, (batch, embed_size), jnp.float32)
    params = init_params(kp, embed_size, ans_vocab_size)

    out = mlp_block_pallas(x, params)
    out = jax.block_until_ready(out)

    ref = mlp_block_ref(x, params)
    assert out.shape == (batch, ans_vocab_size)
    assert jnp.allclose(out, ref, atol=1e-2, rtol=1e-2), "mismatch vs JAX reference"

    print("KERNEL_OK")
</pallas_src>

<mosaic_0001>
module attributes {stable_mosaic.version = 11 : i64} {
  func.func @mlp_block_kernel(%arg0: i32, %arg1: memref<8x32xf32, #tpu.memory_space<vmem>>, %arg2: memref<32x1024xbf16, #tpu.memory_space<vmem>>, %arg3: memref<1x1024xf32, #tpu.memory_space<vmem>>, %arg4: memref<1x1024xf32, #tpu.memory_space<vmem>>, %arg5: memref<1x1024xf32, #tpu.memory_space<vmem>>, %arg6: memref<1024x512xbf16, #tpu.memory_space<vmem>>, %arg7: memref<1x512xf32, #tpu.memory_space<vmem>>, %arg8: memref<1x512xf32, #tpu.memory_space<vmem>>, %arg9: memref<1x512xf32, #tpu.memory_space<vmem>>, %arg10: memref<512x256xbf16, #tpu.memory_space<vmem>>, %arg11: memref<1x256xf32, #tpu.memory_space<vmem>>, %arg12: memref<1x256xf32, #tpu.memory_space<vmem>>, %arg13: memref<1x256xf32, #tpu.memory_space<vmem>>, %arg14: memref<256x128xbf16, #tpu.memory_space<vmem>>, %arg15: memref<1x128xf32, #tpu.memory_space<vmem>>, %arg16: memref<8x128xf32, #tpu.memory_space<vmem>>) attributes {dimension_semantics = [#tpu.dimension_semantics<parallel>], iteration_bounds = array<i64: 1>, scalar_prefetch = 0 : i64, scratch_operands = 0 : i64, tpu.core_type = #tpu.core_type<tc>, window_params = [{transform_indices = @transform_0, window_bounds = array<i64: 8, 32>}, {pipeline_mode = #tpu.pipeline_mode<synchronous>, transform_indices = @transform_1, window_bounds = array<i64: 32, 1024>}, {pipeline_mode = #tpu.pipeline_mode<synchronous>, transform_indices = @transform_2, window_bounds = array<i64: 1, 1024>}, {pipeline_mode = #tpu.pipeline_mode<synchronous>, transform_indices = @transform_3, window_bounds = array<i64: 1, 1024>}, {pipeline_mode = #tpu.pipeline_mode<synchronous>, transform_indices = @transform_4, window_bounds = array<i64: 1, 1024>}, {pipeline_mode = #tpu.pipeline_mode<synchronous>, transform_indices = @transform_5, window_bounds = array<i64: 1024, 512>}, {pipeline_mode = #tpu.pipeline_mode<synchronous>, transform_indices = @transform_6, window_bounds = array<i64: 1, 512>}, {pipeline_mode = #tpu.pipeline_mode<synchronous>, transform_indices = @transform_7, window_bounds = array<i64: 1, 512>}, {pipeline_mode = #tpu.pipeline_mode<synchronous>, transform_indices = @transform_8, window_bounds = array<i64: 1, 512>}, {pipeline_mode = #tpu.pipeline_mode<synchronous>, transform_indices = @transform_9, window_bounds = array<i64: 512, 256>}, {pipeline_mode = #tpu.pipeline_mode<synchronous>, transform_indices = @transform_10, window_bounds = array<i64: 1, 256>}, {pipeline_mode = #tpu.pipeline_mode<synchronous>, transform_indices = @transform_11, window_bounds = array<i64: 1, 256>}, {pipeline_mode = #tpu.pipeline_mode<synchronous>, transform_indices = @transform_12, window_bounds = array<i64: 1, 256>}, {pipeline_mode = #tpu.pipeline_mode<synchronous>, transform_indices = @transform_13, window_bounds = array<i64: 256, 128>}, {pipeline_mode = #tpu.pipeline_mode<synchronous>, transform_indices = @transform_14, window_bounds = array<i64: 1, 128>}, {transform_indices = @transform_15, window_bounds = array<i64: 8, 128>}]} {
    %c0 = arith.constant 0 : index
    %c0_0 = arith.constant 0 : index
    %0 = vector.load %arg1[%c0, %c0_0] : memref<8x32xf32, #tpu.memory_space<vmem>>, vector<8x32xf32>
    %1 = arith.truncf %0 : vector<8x32xf32> to vector<8x32xbf16>
    %c0_1 = arith.constant 0 : index
    %c0_2 = arith.constant 0 : index
    %2 = vector.load %arg2[%c0_1, %c0_2] : memref<32x1024xbf16, #tpu.memory_space<vmem>>, vector<32x1024xbf16>
    %cst = arith.constant dense<0.000000e+00> : vector<8x1024xf32>
    %3 = tpu.matmul %1, %2, %cst {dimension_numbers = #tpu.dot_dimension_numbers<[1], [0], [0], [1], [0, 0, 1, 1], [], []>} : vector<8x32xbf16>, vector<32x1024xbf16>, vector<8x1024xf32> -> vector<8x1024xf32>
    %c0_3 = arith.constant 0 : index
    %c0_4 = arith.constant 0 : index
    %4 = vector.load %arg3[%c0_3, %c0_4] : memref<1x1024xf32, #tpu.memory_space<vmem>>, vector<1x1024xf32>
    %5 = vector.broadcast %4 : vector<1x1024xf32> to vector<8x1024xf32>
    %6 = arith.addf %3, %5 : vector<8x1024xf32>
    %cst_5 = arith.constant 5.000000e-01 : f32
    %7 = vector.broadcast %cst_5 : f32 to vector<8x1024xf32>
    %8 = arith.mulf %7, %6 : vector<8x1024xf32>
    %cst_6 = arith.constant 0.707106769 : f32
    %9 = vector.broadcast %cst_6 : f32 to vector<8x1024xf32>
    %10 = arith.mulf %6, %9 : vector<8x1024xf32>
    %11 = math.erf %10 : vector<8x1024xf32>
    %cst_7 = arith.constant 1.000000e+00 : f32
    %12 = vector.broadcast %cst_7 : f32 to vector<8x1024xf32>
    %13 = arith.addf %12, %11 : vector<8x1024xf32>
    %14 = arith.mulf %8, %13 : vector<8x1024xf32>
    %c0_8 = arith.constant 0 : index
    %c0_9 = arith.constant 0 : index
    %15 = vector.load %arg4[%c0_8, %c0_9] : memref<1x1024xf32, #tpu.memory_space<vmem>>, vector<1x1024xf32>
    %c0_10 = arith.constant 0 : index
    %c0_11 = arith.constant 0 : index
    %16 = vector.load %arg5[%c0_10, %c0_11] : memref<1x1024xf32, #tpu.memory_space<vmem>>, vector<1x1024xf32>
    %cst_12 = arith.constant dense<0.000000e+00> : vector<8xf32>
    %17 = vector.multi_reduction <add>, %14, %cst_12 [1] : vector<8x1024xf32> to vector<8xf32>
    %18 = vector.shape_cast %17 : vector<8xf32> to vector<8x1xf32>
    %cst_13 = arith.constant 1.024000e+03 : f32
    %19 = vector.broadcast %cst_13 : f32 to vector<8x1xf32>
    %20 = arith.divf %18, %19 : vector<8x1xf32>
    %21 = arith.mulf %14, %14 : vector<8x1024xf32>
    %cst_14 = arith.constant dense<0.000000e+00> : vector<8xf32>
    %22 = vector.multi_reduction <add>, %21, %cst_14 [1] : vector<8x1024xf32> to vector<8xf32>
    %23 = vector.shape_cast %22 : vector<8xf32> to vector<8x1xf32>
    %cst_15 = arith.constant 1.024000e+03 : f32
    %24 = vector.broadcast %cst_15 : f32 to vector<8x1xf32>
    %25 = arith.divf %23, %24 : vector<8x1xf32>
    %26 = arith.mulf %20, %20 : vector<8x1xf32>
    %27 = arith.subf %25, %26 : vector<8x1xf32>
    %cst_16 = arith.constant 0.000000e+00 : f32
    %28 = vector.broadcast %cst_16 : f32 to vector<8x1xf32>
    %29 = arith.maximumf %27, %28 : vector<8x1xf32>
    %30 = vector.broadcast %20 : vector<8x1xf32> to vector<8x1024xf32>
    %31 = arith.subf %14, %30 : vector<8x1024xf32>
    %cst_17 = arith.constant 9.99999974E-6 : f32
    %32 = vector.broadcast %cst_17 : f32 to vector<8x1xf32>
    %33 = arith.addf %29, %32 : vector<8x1xf32>
    %34 = math.rsqrt %33 : vector<8x1xf32>
    %35 = vector.broadcast %34 : vector<8x1xf32> to vector<8x1024xf32>
    %36 = arith.mulf %31, %35 : vector<8x1024xf32>
    %37 = vector.broadcast %15 : vector<1x1024xf32> to vector<8x1024xf32>
    %38 = arith.mulf %36, %37 : vector<8x1024xf32>
    %39 = vector.broadcast %16 : vector<1x1024xf32> to vector<8x1024xf32>
    %40 = arith.addf %38, %39 : vector<8x1024xf32>
    %41 = arith.truncf %40 : vector<8x1024xf32> to vector<8x1024xbf16>
    %c0_18 = arith.constant 0 : index
    %c0_19 = arith.constant 0 : index
    %42 = vector.load %arg6[%c0_18, %c0_19] : memref<1024x512xbf16, #tpu.memory_space<vmem>>, vector<1024x512xbf16>
    %cst_20 = arith.constant dense<0.000000e+00> : vector<8x512xf32>
    %43 = tpu.matmul %41, %42, %cst_20 {dimension_numbers = #tpu.dot_dimension_numbers<[1], [0], [0], [1], [0, 0, 1, 1], [], []>} : vector<8x1024xbf16>, vector<1024x512xbf16>, vector<8x512xf32> -> vector<8x512xf32>
    %c0_21 = arith.constant 0 : index
    %c0_22 = arith.constant 0 : index
    %44 = vector.load %arg7[%c0_21, %c0_22] : memref<1x512xf32, #tpu.memory_space<vmem>>, vector<1x512xf32>
    %45 = vector.broadcast %44 : vector<1x512xf32> to vector<8x512xf32>
    %46 = arith.addf %43, %45 : vector<8x512xf32>
    %cst_23 = arith.constant 5.000000e-01 : f32
    %47 = vector.broadcast %cst_23 : f32 to vector<8x512xf32>
    %48 = arith.mulf %47, %46 : vector<8x512xf32>
    %cst_24 = arith.constant 0.707106769 : f32
    %49 = vector.broadcast %cst_24 : f32 to vector<8x512xf32>
    %50 = arith.mulf %46, %49 : vector<8x512xf32>
    %51 = math.erf %50 : vector<8x512xf32>
    %cst_25 = arith.constant 1.000000e+00 : f32
    %52 = vector.broadcast %cst_25 : f32 to vector<8x512xf32>
    %53 = arith.addf %52, %51 : vector<8x512xf32>
    %54 = arith.mulf %48, %53 : vector<8x512xf32>
    %c0_26 = arith.constant 0 : index
    %c0_27 = arith.constant 0 : index
    %55 = vector.load %arg8[%c0_26, %c0_27] : memref<1x512xf32, #tpu.memory_space<vmem>>, vector<1x512xf32>
    %c0_28 = arith.constant 0 : index
    %c0_29 = arith.constant 0 : index
    %56 = vector.load %arg9[%c0_28, %c0_29] : memref<1x512xf32, #tpu.memory_space<vmem>>, vector<1x512xf32>
    %cst_30 = arith.constant dense<0.000000e+00> : vector<8xf32>
    %57 = vector.multi_reduction <add>, %54, %cst_30 [1] : vector<8x512xf32> to vector<8xf32>
    %58 = vector.shape_cast %57 : vector<8xf32> to vector<8x1xf32>
    %cst_31 = arith.constant 5.120000e+02 : f32
    %59 = vector.broadcast %cst_31 : f32 to vector<8x1xf32>
    %60 = arith.divf %58, %59 : vector<8x1xf32>
    %61 = arith.mulf %54, %54 : vector<8x512xf32>
    %cst_32 = arith.constant dense<0.000000e+00> : vector<8xf32>
    %62 = vector.multi_reduction <add>, %61, %cst_32 [1] : vector<8x512xf32> to vector<8xf32>
    %63 = vector.shape_cast %62 : vector<8xf32> to vector<8x1xf32>
    %cst_33 = arith.constant 5.120000e+02 : f32
    %64 = vector.broadcast %cst_33 : f32 to vector<8x1xf32>
    %65 = arith.divf %63, %64 : vector<8x1xf32>
    %66 = arith.mulf %60, %60 : vector<8x1xf32>
    %67 = arith.subf %65, %66 : vector<8x1xf32>
    %cst_34 = arith.constant 0.000000e+00 : f32
    %68 = vector.broadcast %cst_34 : f32 to vector<8x1xf32>
    %69 = arith.maximumf %67, %68 : vector<8x1xf32>
    %70 = vector.broadcast %60 : vector<8x1xf32> to vector<8x512xf32>
    %71 = arith.subf %54, %70 : vector<8x512xf32>
    %cst_35 = arith.constant 9.99999974E-6 : f32
    %72 = vector.broadcast %cst_35 : f32 to vector<8x1xf32>
    %73 = arith.addf %69, %72 : vector<8x1xf32>
    %74 = math.rsqrt %73 : vector<8x1xf32>
    %75 = vector.broadcast %74 : vector<8x1xf32> to vector<8x512xf32>
    %76 = arith.mulf %71, %75 : vector<8x512xf32>
    %77 = vector.broadcast %55 : vector<1x512xf32> to vector<8x512xf32>
    %78 = arith.mulf %76, %77 : vector<8x512xf32>
    %79 = vector.broadcast %56 : vector<1x512xf32> to vector<8x512xf32>
    %80 = arith.addf %78, %79 : vector<8x512xf32>
    %81 = arith.truncf %80 : vector<8x512xf32> to vector<8x512xbf16>
    %c0_36 = arith.constant 0 : index
    %c0_37 = arith.constant 0 : index
    %82 = vector.load %arg10[%c0_36, %c0_37] : memref<512x256xbf16, #tpu.memory_space<vmem>>, vector<512x256xbf16>
    %cst_38 = arith.constant dense<0.000000e+00> : vector<8x256xf32>
    %83 = tpu.matmul %81, %82, %cst_38 {dimension_numbers = #tpu.dot_dimension_numbers<[1], [0], [0], [1], [0, 0, 1, 1], [], []>} : vector<8x512xbf16>, vector<512x256xbf16>, vector<8x256xf32> -> vector<8x256xf32>
    %c0_39 = arith.constant 0 : index
    %c0_40 = arith.constant 0 : index
    %84 = vector.load %arg11[%c0_39, %c0_40] : memref<1x256xf32, #tpu.memory_space<vmem>>, vector<1x256xf32>
    %85 = vector.broadcast %84 : vector<1x256xf32> to vector<8x256xf32>
    %86 = arith.addf %83, %85 : vector<8x256xf32>
    %cst_41 = arith.constant 5.000000e-01 : f32
    %87 = vector.broadcast %cst_41 : f32 to vector<8x256xf32>
    %88 = arith.mulf %87, %86 : vector<8x256xf32>
    %cst_42 = arith.constant 0.707106769 : f32
    %89 = vector.broadcast %cst_42 : f32 to vector<8x256xf32>
    %90 = arith.mulf %86, %89 : vector<8x256xf32>
    %91 = math.erf %90 : vector<8x256xf32>
    %cst_43 = arith.constant 1.000000e+00 : f32
    %92 = vector.broadcast %cst_43 : f32 to vector<8x256xf32>
    %93 = arith.addf %92, %91 : vector<8x256xf32>
    %94 = arith.mulf %88, %93 : vector<8x256xf32>
    %c0_44 = arith.constant 0 : index
    %c0_45 = arith.constant 0 : index
    %95 = vector.load %arg12[%c0_44, %c0_45] : memref<1x256xf32, #tpu.memory_space<vmem>>, vector<1x256xf32>
    %c0_46 = arith.constant 0 : index
    %c0_47 = arith.constant 0 : index
    %96 = vector.load %arg13[%c0_46, %c0_47] : memref<1x256xf32, #tpu.memory_space<vmem>>, vector<1x256xf32>
    %cst_48 = arith.constant dense<0.000000e+00> : vector<8xf32>
    %97 = vector.multi_reduction <add>, %94, %cst_48 [1] : vector<8x256xf32> to vector<8xf32>
    %98 = vector.shape_cast %97 : vector<8xf32> to vector<8x1xf32>
    %cst_49 = arith.constant 2.560000e+02 : f32
    %99 = vector.broadcast %cst_49 : f32 to vector<8x1xf32>
    %100 = arith.divf %98, %99 : vector<8x1xf32>
    %101 = arith.mulf %94, %94 : vector<8x256xf32>
    %cst_50 = arith.constant dense<0.000000e+00> : vector<8xf32>
    %102 = vector.multi_reduction <add>, %101, %cst_50 [1] : vector<8x256xf32> to vector<8xf32>
    %103 = vector.shape_cast %102 : vector<8xf32> to vector<8x1xf32>
    %cst_51 = arith.constant 2.560000e+02 : f32
    %104 = vector.broadcast %cst_51 : f32 to vector<8x1xf32>
    %105 = arith.divf %103, %104 : vector<8x1xf32>
    %106 = arith.mulf %100, %100 : vector<8x1xf32>
    %107 = arith.subf %105, %106 : vector<8x1xf32>
    %cst_52 = arith.constant 0.000000e+00 : f32
    %108 = vector.broadcast %cst_52 : f32 to vector<8x1xf32>
    %109 = arith.maximumf %107, %108 : vector<8x1xf32>
    %110 = vector.broadcast %100 : vector<8x1xf32> to vector<8x256xf32>
    %111 = arith.subf %94, %110 : vector<8x256xf32>
    %cst_53 = arith.constant 9.99999974E-6 : f32
    %112 = vector.broadcast %cst_53 : f32 to vector<8x1xf32>
    %113 = arith.addf %109, %112 : vector<8x1xf32>
    %114 = math.rsqrt %113 : vector<8x1xf32>
    %115 = vector.broadcast %114 : vector<8x1xf32> to vector<8x256xf32>
    %116 = arith.mulf %111, %115 : vector<8x256xf32>
    %117 = vector.broadcast %95 : vector<1x256xf32> to vector<8x256xf32>
    %118 = arith.mulf %116, %117 : vector<8x256xf32>
    %119 = vector.broadcast %96 : vector<1x256xf32> to vector<8x256xf32>
    %120 = arith.addf %118, %119 : vector<8x256xf32>
    %121 = arith.truncf %120 : vector<8x256xf32> to vector<8x256xbf16>
    %c0_54 = arith.constant 0 : index
    %c0_55 = arith.constant 0 : index
    %122 = vector.load %arg14[%c0_54, %c0_55] : memref<256x128xbf16, #tpu.memory_space<vmem>>, vector<256x128xbf16>
    %cst_56 = arith.constant dense<0.000000e+00> : vector<8x128xf32>
    %123 = tpu.matmul %121, %122, %cst_56 {dimension_numbers = #tpu.dot_dimension_numbers<[1], [0], [0], [1], [0, 0, 1, 1], [], []>} : vector<8x256xbf16>, vector<256x128xbf16>, vector<8x128xf32> -> vector<8x128xf32>
    %c0_57 = arith.constant 0 : index
    %c0_58 = arith.constant 0 : index
    %124 = vector.load %arg15[%c0_57, %c0_58] : memref<1x128xf32, #tpu.memory_space<vmem>>, vector<1x128xf32>
    %125 = vector.broadcast %124 : vector<1x128xf32> to vector<8x128xf32>
    %126 = arith.addf %123, %125 : vector<8x128xf32>
    %c0_59 = arith.constant 0 : index
    %c0_60 = arith.constant 0 : index
    %127 = vector.load %arg16[%c0_59, %c0_60] : memref<8x128xf32, #tpu.memory_space<vmem>>, vector<8x128xf32>
    tpu.vector_store %arg16[%c0_59, %c0_60], %126 {strides = array<i32>} : memref<8x128xf32, #tpu.memory_space<vmem>>, vector<8x128xf32>,
    return
  }
  func.func @transform_0(%arg0: i32) -> (i32, i32) {
    %c0_i32 = arith.constant 0 : i32
    %c0_i32_0 = arith.constant 0 : i32
    return %arg0, %c0_i32 : i32, i32
  }
  func.func @transform_1(%arg0: i32) -> (i32, i32) {
    %c0_i32 = arith.constant 0 : i32
    %c0_i32_0 = arith.constant 0 : i32
    %c0_i32_1 = arith.constant 0 : i32
    return %c0_i32, %c0_i32_0 : i32, i32
  }
  func.func @transform_2(%arg0: i32) -> (i32, i32) {
    %c0_i32 = arith.constant 0 : i32
    %c0_i32_0 = arith.constant 0 : i32
    %c0_i32_1 = arith.constant 0 : i32
    return %c0_i32, %c0_i32_0 : i32, i32
  }
  func.func @transform_3(%arg0: i32) -> (i32, i32) {
    %c0_i32 = arith.constant 0 : i32
    %c0_i32_0 = arith.constant 0 : i32
    %c0_i32_1 = arith.constant 0 : i32
    return %c0_i32, %c0_i32_0 : i32, i32
  }
  func.func @transform_4(%arg0: i32) -> (i32, i32) {
    %c0_i32 = arith.constant 0 : i32
    %c0_i32_0 = arith.constant 0 : i32
    %c0_i32_1 = arith.constant 0 : i32
    return %c0_i32, %c0_i32_0 : i32, i32
  }
  func.func @transform_5(%arg0: i32) -> (i32, i32) {
    %c0_i32 = arith.constant 0 : i32
    %c0_i32_0 = arith.constant 0 : i32
    %c0_i32_1 = arith.constant 0 : i32
    return %c0_i32, %c0_i32_0 : i32, i32
  }
  func.func @transform_6(%arg0: i32) -> (i32, i32) {
    %c0_i32 = arith.constant 0 : i32
    %c0_i32_0 = arith.constant 0 : i32
    %c0_i32_1 = arith.constant 0 : i32
    return %c0_i32, %c0_i32_0 : i32, i32
  }
  func.func @transform_7(%arg0: i32) -> (i32, i32) {
    %c0_i32 = arith.constant 0 : i32
    %c0_i32_0 = arith.constant 0 : i32
    %c0_i32_1 = arith.constant 0 : i32
    return %c0_i32, %c0_i32_0 : i32, i32
  }
  func.func @transform_8(%arg0: i32) -> (i32, i32) {
    %c0_i32 = arith.constant 0 : i32
    %c0_i32_0 = arith.constant 0 : i32
    %c0_i32_1 = arith.constant 0 : i32
    return %c0_i32, %c0_i32_0 : i32, i32
  }
  func.func @transform_9(%arg0: i32) -> (i32, i32) {
    %c0_i32 = arith.constant 0 : i32
    %c0_i32_0 = arith.constant 0 : i32
    %c0_i32_1 = arith.constant 0 : i32
    return %c0_i32, %c0_i32_0 : i32, i32
  }
  func.func @transform_10(%arg0: i32) -> (i32, i32) {
    %c0_i32 = arith.constant 0 : i32
    %c0_i32_0 = arith.constant 0 : i32
    %c0_i32_1 = arith.constant 0 : i32
    return %c0_i32, %c0_i32_0 : i32, i32
  }
  func.func @transform_11(%arg0: i32) -> (i32, i32) {
    %c0_i32 = arith.constant 0 : i32
    %c0_i32_0 = arith.constant 0 : i32
    %c0_i32_1 = arith.constant 0 : i32
    return %c0_i32, %c0_i32_0 : i32, i32
  }
  func.func @transform_12(%arg0: i32) -> (i32, i32) {
    %c0_i32 = arith.constant 0 : i32
    %c0_i32_0 = arith.constant 0 : i32
    %c0_i32_1 = arith.constant 0 : i32
    return %c0_i32, %c0_i32_0 : i32, i32
  }
  func.func @transform_13(%arg0: i32) -> (i32, i32) {
    %c0_i32 = arith.constant 0 : i32
    %c0_i32_0 = arith.constant 0 : i32
    %c0_i32_1 = arith.constant 0 : i32
    return %c0_i32, %c0_i32_0 : i32, i32
  }
  func.func @transform_14(%arg0: i32) -> (i32, i32) {
    %c0_i32 = arith.constant 0 : i32
    %c0_i32_0 = arith.constant 0 : i32
    %c0_i32_1 = arith.constant 0 : i32
    return %c0_i32, %c0_i32_0 : i32, i32
  }
  func.func @transform_15(%arg0: i32) -> (i32, i32) {
    %c0_i32 = arith.constant 0 : i32
    %c0_i32_0 = arith.constant 0 : i32
    return %arg0, %c0_i32 : i32, i32
  }
}

</mosaic_0001>

<bundles_post_ra>
// kernel: tpu_custom_call.1
= control target key start
LH: loop header
LB: loop body
LE: loop exit
PB: predicated region body
PF: predicated region fallthrough
CT: control target
= control target key end

     0   :  { %20 = vsyncpa [#allocation3], 0  ;;  %s4837_s0 = inlined_call_operand.hbm [shape: f32[8,32], index: 0, kind: input, shape index: {}]   ;;  %s4838_s1 = inlined_call_operand.hbm [shape: bf16[32,1024], index: 1, kind: input, shape index: {}]   ;;  %s4839_s2 = inlined_call_operand.hbm [shape: f32[1,1024], index: 2, kind: input, shape index: {}]   ;;  %s4840_s3 = inlined_call_operand.hbm [shape: f32[1,1024], index: 3, kind: input, shape index: {}]   ;;  %s4841_s4 = inlined_call_operand.hbm [shape: f32[1,1024], index: 4, kind: input, shape index: {}]   ;;  %s4842_s5 = inlined_call_operand.hbm [shape: bf16[1024,512], index: 5, kind: input, shape index: {}]   ;;  %s4843_s6 = inlined_call_operand.vmem [shape: f32[1,512], index: 6, kind: input, shape index: {}]   ;;  %s4844_s7 = inlined_call_operand.vmem [shape: f32[1,512], index: 7, kind: input, shape index: {}]   ;;  %s4845_s8 = inlined_call_operand.vmem [shape: f32[1,512], index: 8, kind: input, shape index: {}]   ;;  %s4846_s9 = inlined_call_operand.hbm [shape: bf16[512,256], index: 9, kind: input, shape index: {}]   ;;  %s4847_s10 = inlined_call_operand.vmem [shape: f32[1,256], index: 10, kind: input, shape index: {}]   ;;  %s4848_s11 = inlined_call_operand.vmem [shape: f32[1,256], index: 11, kind: input, shape index: {}]   ;;  %s4849_s12 = inlined_call_operand.vmem [shape: f32[1,256], index: 12, kind: input, shape index: {}]   ;;  %s4850_s13 = inlined_call_operand.hbm [shape: bf16[256,128], index: 13, kind: input, shape index: {}]   ;;  %s4851_s14 = inlined_call_operand.vmem [shape: f32[1,128], index: 14, kind: input, shape index: {}]   ;;  %s4852_s15 = inlined_call_operand.hbm [shape: f32[8,128], index: 15, kind: output, shape index: {}]  }
   0x1   :  { %21 = vsyncpa [#allocation6], 0 }
   0x2   :  { %22 = vsyncpa [#allocation9], 0 }
   0x3   :  { %23 = vsyncpa [#allocation12], 0 }
   0x4   :  { %24 = vsyncpa [#allocation15], 0 }
   0x5   :  { %25 = vsyncpa [#allocation4], 0  ;;  %s4503_s18 = smov [#allocation5]  }
   0x6   :  { %s41_s19 = sshll.u32 %s4503_s18, 4  ;;  %s42_s19 = int_to_ptr.vmem [resolvable:$true] %s41_s19 }
   0x7   :  { %s4319_s20 = scalar_lea.vmem %s42_s19, 2048  ;;  %p4324_p1 = scmp.lt.s32.totalorder %s42_s19, %s42_s19 }
   0x8   :  { %p4320_p0 = scmp.ne.s32.totalorder %s42_s19, %s4319_s20  ;;  %p4325_p2 = scmp.lt.s32.totalorder %s4319_s20, %s4319_s20 }
   0xa   :  { %p4326_p3 = por %p4325_p2, %p4324_p1 }
   0xc   :  { %p4327_p4 = pnand %p4326_p3, %p4320_p0 }
   0xe   :  { %4330 = shalt.err (!%p4327_p4)
}
   0xf   :  { %s4504_s21 = smov 512   ;;  %s4505_s22 = smov 32  }
  0x10   :  { %47 = dma.hbm_to_vmem [thread:$0]  %s4838_s1, 2048, %s42_s19, [#allocation6], %s4504_s21, %s4504_s21, %s4505_s22  }
  0x11   :  { %s4506_s25 = smov [#allocation8]   ;;  %s4507_s27 = smov [#allocation11]  }
  0x12   :  { %s64_s26 = sshll.u32 %s4506_s25, 4  ;;  %s83_s28 = sshll.u32 %s4507_s27, 4  ;;  %s65_s26 = int_to_ptr.vmem [resolvable:$true] %s64_s26  ;;  %s84_s28 = int_to_ptr.vmem [resolvable:$true] %s83_s28 }
  0x13   :  { %s4339_s29 = scalar_lea.vmem %s65_s26, 128  ;;  %p4344_p6 = scmp.lt.s32.totalorder %s65_s26, %s65_s26 }
  0x14   :  { %p4340_p5 = scmp.ne.s32.totalorder %s65_s26, %s4339_s29  ;;  %p4345_p7 = scmp.lt.s32.totalorder %s4339_s29, %s4339_s29 }
  0x16   :  { %p4346_p8 = por %p4345_p7, %p4344_p6 }
  0x18   :  { %p4347_p9 = pnand %p4346_p8, %p4340_p5 }
  0x1a   :  { %4350 = shalt.err (!%p4347_p9)
}
  0x1b   :  { %67 = dma.hbm_to_vmem [thread:$0]  %s4840_s3, 128, %s65_s26, [#allocation9]  }
  0x1c   :  { %s4359_s17 = scalar_lea.vmem %s84_s28, 32768  ;;  %p4364_p11 = scmp.lt.s32.totalorder %s84_s28, %s84_s28 }
  0x1d   :  { %p4360_p10 = scmp.ne.s32.totalorder %s84_s28, %s4359_s17  ;;  %p4365_p12 = scmp.lt.s32.totalorder %s4359_s17, %s4359_s17 }
  0x1f   :  { %p4366_p13 = por %p4365_p12, %p4364_p11 }
  0x21   :  { %p4367_p0 = pnand %p4366_p13, %p4360_p10 }
  0x23   :  { %4370 = shalt.err (!%p4367_p0)
}
  0x24   :  { %s4508_s1 = smov 256   ;;  %s4509_s18 = smov 16  }
  0x25   :  { %89 = dma.hbm_to_vmem [thread:$0]  %s4842_s5, 32768, %s84_s28, [#allocation12], %s4508_s1, %s4508_s1, %s4509_s18  }
  0x26   :  { %s4510_s21 = smov [#allocation2]   ;;  %s4511_s23 = smov [#allocation7]  }
  0x27   :  { %s32_s22 = sshll.u32 %s4510_s21, 4  ;;  %s54_s24 = sshll.u32 %s4511_s23, 4  ;;  %s33_s22 = int_to_ptr.vmem [resolvable:$true] %s32_s22  ;;  %s55_s24 = int_to_ptr.vmem [resolvable:$true] %s54_s24 }
  0x28   :  { %s4379_s3 = scalar_lea.vmem %s33_s22, 128  ;;  %p4384_p2 = scmp.lt.s32.totalorder %s33_s22, %s33_s22 }
  0x29   :  { %p4380_p1 = scmp.ne.s32.totalorder %s33_s22, %s4379_s3  ;;  %p4385_p3 = scmp.lt.s32.totalorder %s4379_s3, %s4379_s3 }
  0x2b   :  { %p4386_p4 = por %p4385_p3, %p4384_p2 }
  0x2d   :  { %p4387_p5 = pnand %p4386_p4, %p4380_p1 }
  0x2f   :  { %4390 = shalt.err (!%p4387_p5)
}
  0x30   :  { %35 = dma.hbm_to_vmem [thread:$0]  %s4837_s0, 128, %s33_s22, [#allocation3]  }
  0x31   :  { %s4399_s27 = scalar_lea.vmem %s55_s24, 128  ;;  %p4404_p7 = scmp.lt.s32.totalorder %s55_s24, %s55_s24 }
  0x32   :  { %p4400_p6 = scmp.ne.s32.totalorder %s55_s24, %s4399_s27  ;;  %p4405_p8 = scmp.lt.s32.totalorder %s4399_s27, %s4399_s27 }
  0x34   :  { %p4406_p9 = por %p4405_p8, %p4404_p7 }
  0x36   :  { %p4407_p10 = pnand %p4406_p9, %p4400_p6 }
  0x38   :  { %4410 = shalt.err (!%p4407_p10)
}
  0x39   :  { %57 = dma.hbm_to_vmem [thread:$0]  %s4839_s2, 128, %s55_s24, [#allocation6]  }
  0x3a   :  { %s4512_s29 = smov [#allocation10]   ;;  %s4513_s16 = smov [#allocation13]  }
  0x3b   :  { %s74_s30 = sshll.u32 %s4512_s29, 4  ;;  %s101_s17 = sshll.u32 %s4513_s16, 4  ;;  %s75_s30 = int_to_ptr.vmem [resolvable:$true] %s74_s30  ;;  %s102_s17 = int_to_ptr.vmem [resolvable:$true] %s101_s17 }
  0x3c   :  { %s4419_s1 = scalar_lea.vmem %s75_s30, 128  ;;  %p4424_p12 = scmp.lt.s32.totalorder %s75_s30, %s75_s30 }
  0x3d   :  { %p4420_p11 = scmp.ne.s32.totalorder %s75_s30, %s4419_s1  ;;  %p4425_p13 = scmp.lt.s32.totalorder %s4419_s1, %s4419_s1 }
  0x3f   :  { %p4426_p0 = por %p4425_p13, %p4424_p12 }
  0x41   :  { %p4427_p1 = pnand %p4426_p0, %p4420_p11 }
  0x43   :  { %4430 = shalt.err (!%p4427_p1)
}
  0x44   :  { %77 = dma.hbm_to_vmem [thread:$0]  %s4841_s4, 128, %s75_s30, [#allocation9]  }
  0x45   :  { %s4439_s19 = scalar_lea.vmem %s102_s17, 8192  ;;  %p4444_p3 = scmp.lt.s32.totalorder %s102_s17, %s102_s17 }
  0x46   :  { %p4440_p2 = scmp.ne.s32.totalorder %s102_s17, %s4439_s19  ;;  %p4445_p4 = scmp.lt.s32.totalorder %s4439_s19, %s4439_s19 }
  0x48   :  { %p4446_p5 = por %p4445_p4, %p4444_p3 }
  0x4a   :  { %p4447_p6 = pnand %p4446_p5, %p4440_p2 }
  0x4c   :  { %4450 = shalt.err (!%p4447_p6)
}
  0x4d   :  { %s4514_s2 = smov 128   ;;  %s4515_s20 = smov 8  }
  0x4e   :  { %107 = dma.hbm_to_vmem [thread:$0]  %s4846_s9, 8192, %s102_s17, [#allocation12], %s4514_s2, %s4514_s2, %s4515_s20  }
  0x4f   :  { %s4516_s23 = smov [#allocation14]  }
  0x50   :  { %s119_s24 = sshll.u32 %s4516_s23, 4  ;;  %s120_s24 = int_to_ptr.vmem [resolvable:$true] %s119_s24 }
  0x51   :  { %s4459_s3 = scalar_lea.vmem %s120_s24, 2048  ;;  %p4464_p8 = scmp.lt.s32.totalorder %s120_s24, %s120_s24 }
  0x52   :  { %p4460_p7 = scmp.ne.s32.totalorder %s120_s24, %s4459_s3  ;;  %p4465_p9 = scmp.lt.s32.totalorder %s4459_s3, %s4459_s3 }
  0x54   :  { %p4466_p10 = por %p4465_p9, %p4464_p8 }
  0x56   :  { %p4467_p11 = pnand %p4466_p10, %p4460_p7 }
  0x58   :  { %4470 = shalt.err (!%p4467_p11)
}
  0x59   :  { %s4517_s4 = smov 64   ;;  %s4518_s25 = smov 4  }
  0x5a   :  { %125 = dma.hbm_to_vmem [thread:$0]  %s4850_s13, 2048, %s120_s24, [#allocation15], %s4517_s4, %s4517_s4, %s4518_s25  }
  0x5b   :  { %4491 = dma.done.wait [#allocation3], 128  }
  0x5c   :  { %4492 = vsyncadd [#allocation3], 4294967168 }
  0x5d   :  { %4493 = dma.done.wait [#allocation6], 2176  }
  0x5e   :  { %4494 = vsyncadd [#allocation6], 4294965120 }
  0x5f   :  { %4495 = dma.done.wait [#allocation9], 256  }
  0x60   :  { %4496 = vsyncadd [#allocation9], 4294967040 }
  0x61   :  { %4497 = dma.done.wait [#allocation12], 40960  }
  0x62   :  { %4498 = vsyncadd [#allocation12], 4294926336 }
  0x63   :  { %4499 = dma.done.wait [#allocation15], 2048  }
  0x64   :  { %4500 = vsyncadd [#allocation15], 4294965248  ;;  %v4519_v0 = vmov 0   ;;  %v163_v1 = vld [vmem:[#allocation5 + $0x40] sm:$0xff]  ;;  %v164_v8 = vld [vmem:[#allocation5 + $0x48] sm:$0xff]  ;;  %vm293_vm0 = vcmask 261120  }
  0x65   :  { %329 = vmatprep.mubr.bf16.mxu1 %v4519_v0  ;;  %v167_v2 = vld [vmem:[#allocation5 + $0x60] sm:$0xff]  ;;  %v168_v9 = vld [vmem:[#allocation5 + $0x68] sm:$0xff]  ;;  %v153_v11 = vld [vmem:[#allocation2] sm:$0xff]  ;;  %s4520_s1 = smov [#allocation16]  }
  0x66   :  { %v155_v3 = vld [vmem:[#allocation5] sm:$0xff]  ;;  %v3393_v4 = vcombine.high %v163_v1, %v167_v2  ;;  %v3392_v5 = vcombine.low %v163_v1, %v167_v2  ;;  %v3395_v12 = vcombine.high %v164_v8, %v168_v9  ;;  %v156_v13 = vld [vmem:[#allocation5 + $0x8] sm:$0xff]  ;;  %v154_v15 = vpack.c.bf16 %v153_v11, %v153_v11  ;;  %v165_v17 = vld [vmem:[#allocation5 + $0x50] sm:$0xff]  ;;  %s3371_s0 = sshll.u32 %s4520_s1, 4  ;;  %s3372_s0 = int_to_ptr.vmem [resolvable:$true] %s3371_s0 }
  0x67   :  { %v159_v6 = vld [vmem:[#allocation5 + $0x20] sm:$0xff]  ;;  %v160_v14 = vld [vmem:[#allocation5 + $0x28] sm:$0xff]  ;;  %v3394_v16 = vcombine.low %v164_v8, %v168_v9  ;;  %v169_v18 = vld [vmem:[#allocation5 + $0x70] sm:$0xff]  ;;  %s4471_s18 = scalar_lea.vmem %s3372_s0, 128  ;;  %p4476_p13 = scmp.lt.s32.totalorder %s3372_s0, %s3372_s0 }
  0x68   :  { %v3385_v7 = vcombine.high %v155_v3, %v159_v6  ;;  %309 = vmatprep.subr.bf16.mxu1 %v3393_v4  ;;  %v3384_v10 = vcombine.low %v155_v3, %v159_v6  ;;  %v3387_v19 = vcombine.high %v156_v13, %v160_v14  ;;  %v3386_v20 = vcombine.low %v156_v13, %v160_v14  ;;  %v157_v21 = vld [vmem:[#allocation5 + $0x10] sm:$0xff]  ;;  %v166_v25 = vld [vmem:[#allocation5 + $0x58] sm:$0xff]  ;;  %v171_v6 = vld [vmem:[#allocation7] sm:$0xff]  ;;  %p4472_p12 = scmp.ne.s32.totalorder %s3372_s0, %s4471_s18  ;;  %p4477_p0 = scmp.lt.s32.totalorder %s4471_s18, %s4471_s18 }
  0x69   :  { %310 = vmatpush1.bf16.msra.mxu1 %v3392_v5  ;;  %v161_v22 = vld [vmem:[#allocation5 + $0x30] sm:$0xff]  ;;  %v3397_v23 = vcombine.high %v165_v17, %v169_v18  ;;  %v3396_v24 = vcombine.low %v165_v17, %v169_v18  ;;  %v170_v26 = vld [vmem:[#allocation5 + $0x78] sm:$0xff]  ;;  %v173_v3 = vlaneseq }
  0x6a   :  { %311 = vmatprep.subr.bf16.mxu1 %v3385_v7  ;;  %v3389_v27 = vcombine.high %v157_v21, %v161_v22  ;;  %v3388_v28 = vcombine.low %v157_v21, %v161_v22  ;;  %v158_v29 = vld [vmem:[#allocation5 + $0x18] sm:$0xff]  ;;  %v3399_v31 = vcombine.high %v166_v25, %v170_v26  ;;  %v3398_v32 = vcombine.low %v166_v25, %v170_v26  ;;  %p4478_p1 = por %p4477_p0, %p4476_p13 }
  0x6b   :  { %v162_v30 = vld [vmem:[#allocation5 + $0x38] sm:$0xff]  ;;  %v174_v4 = vshrl.u32 %v173_v3, 7 }
  0x6c   :  { %v3391_v33 = vcombine.high %v158_v29, %v162_v30  ;;  %v3390_v34 = vcombine.low %v158_v29, %v162_v30  ;;  %v3781_v35 = vld [vmem:[#allocation11 + $0xe4] ss:$16 sps:$4 sm:$0xff]   ;;  %v3783_v36 = vld [vmem:[#allocation11 + $0x2e0] ss:$16 sps:$4 sm:$0xff]   ;;  %p4479_p2 = pnand %p4478_p1, %p4472_p12 }
  0x6d   :  { %312 = vmatpush1.bf16.msra.mxu1 %v3384_v10  ;;  %v3785_v37 = vld [vmem:[#allocation11 + $0x2e4] ss:$16 sps:$4 sm:$0xff]   ;;  %v3786_v38 = vld [vmem:[#allocation11 + $0xe0] ss:$16 sps:$4 sm:$0xff]   ;;  %2217 = vmatprep.subr.bf16.mxu0 %v3781_v35  ;;  %v4629_v5 = vsub.s32 0, %v174_v4  ;;  %v4631_v7 = vsub.s32 1, %v174_v4 }
  0x6e   :  { %350 = vmatprep.subr.bf16.mxu1 %v3395_v12  ;;  %v3787_v39 = vld [vmem:[#allocation11 + $0xc4] ss:$16 sps:$4 sm:$0xff]   ;;  %2218 = vmatpush1.bf16.msra.mxu0 %v3786_v38  ;;  %v3789_v41 = vld [vmem:[#allocation11 + $0x2c0] ss:$16 sps:$4 sm:$0xff]   ;;  %v4635_v11 = vsub.s32 2, %v174_v4 }
  0x6f   :  { %v3791_v40 = vld [vmem:[#allocation11 + $0x2c4] ss:$16 sps:$4 sm:$0xff]   ;;  %v3792_v42 = vld [vmem:[#allocation11 + $0xc0] ss:$16 sps:$4 sm:$0xff]   ;;  %2219 = vmatprep.subr.bf16.mxu0 %v3787_v39  ;;  %v176_v8 = vrot.slane %v171_v6, %v4629_v5  ;;  %v180_v9 = vrot.slane %v171_v6, %v4631_v7 }
  0x70   :  { %3400 = vmatmul.mubr.msk.bf16.vlgmr.msra.gmra.mxu1 %vm293_vm0, %v154_v15  ;;  %v3793_v43 = vld [vmem:[#allocation11 + $0xa4] ss:$16 sps:$4 sm:$0xff]   ;;  %v3795_v45 = vld [vmem:[#allocation11 + $0x2a0] ss:$16 sps:$4 sm:$0xff]   ;;  %v184_v18 = vrot.slane %v171_v6, %v4635_v11 }
  0x71   :  { %351 = vmatpush1.bf16.msra.mxu1 %v3394_v16  ;;  %370 = vmatprep.mubr.bf16.mxu1 %v4519_v0  ;;  %v3797_v44 = vld [vmem:[#allocation11 + $0x2a4] ss:$16 sps:$4 sm:$0xff]   ;;  %v3798_v46 = vld [vmem:[#allocation11 + $0xa0] ss:$16 sps:$4 sm:$0xff]  }
  0x72   :  { %352 = vmatprep.subr.bf16.mxu1 %v3387_v19  ;;  %2220 = vmatpush1.bf16.msra.mxu0 %v3792_v42  ;;  %v3799_v47 = vld [vmem:[#allocation11 + $0x84] ss:$16 sps:$4 sm:$0xff]   ;;  %v3801_v49 = vld [vmem:[#allocation11 + $0x280] ss:$16 sps:$4 sm:$0xff]  }
  0x73   :  { %2221 = vmatprep.subr.bf16.mxu0 %v3793_v43  ;;  %v3803_v48 = vld [vmem:[#allocation11 + $0x284] ss:$16 sps:$4 sm:$0xff]   ;;  %v3804_v50 = vld [vmem:[#allocation11 + $0x80] ss:$16 sps:$4 sm:$0xff]  }
  0x74   :  { %v3805_v51 = vld [vmem:[#allocation11 + $0x64] ss:$16 sps:$4 sm:$0xff]   ;;  %v3807_v53 = vld [vmem:[#allocation11 + $0x260] ss:$16 sps:$4 sm:$0xff]  }
  0x75   :  { %353 = vmatpush1.bf16.msra.mxu1 %v3386_v20  ;;  %v3809_v52 = vld [vmem:[#allocation11 + $0x264] ss:$16 sps:$4 sm:$0xff]   ;;  %v3810_v54 = vld [vmem:[#allocation11 + $0x60] ss:$16 sps:$4 sm:$0xff]  }
  0x76   :  { %391 = vmatprep.subr.bf16.mxu1 %v3397_v23  ;;  %2222 = vmatpush1.bf16.msra.mxu0 %v3798_v46  ;;  %v3811_v55 = vld [vmem:[#allocation11 + $0x44] ss:$16 sps:$4 sm:$0xff]   ;;  %v3813_v57 = vld [vmem:[#allocation11 + $0x240] ss:$16 sps:$4 sm:$0xff]  }
  0x77   :  { %2223 = vmatprep.subr.bf16.mxu0 %v3799_v47  ;;  %v3815_v56 = vld [vmem:[#allocation11 + $0x244] ss:$16 sps:$4 sm:$0xff]   ;;  %v3816_v58 = vld [vmem:[#allocation11 + $0x40] ss:$16 sps:$4 sm:$0xff]  }
  0x78   :  { %3401 = vmatmul.mubr.msk.bf16.vlgmr.msra.gmra.mxu1 %vm293_vm0, %v154_v15  ;;  %v3817_v59 = vld [vmem:[#allocation11 + $0x24] ss:$16 sps:$4 sm:$0xff]   ;;  %v3819_v61 = vld [vmem:[#allocation11 + $0x220] ss:$16 sps:$4 sm:$0xff]  }
  0x79   :  { %392 = vmatpush1.bf16.msra.mxu1 %v3396_v24  ;;  %411 = vmatprep.mubr.bf16.mxu1 %v4519_v0  ;;  %v3821_v60 = vld [vmem:[#allocation11 + $0x224] ss:$16 sps:$4 sm:$0xff]   ;;  %v3822_v62 = vld [vmem:[#allocation11 + $0x20] ss:$16 sps:$4 sm:$0xff]   ;;  %v4641_v24 = vsub.s32 4, %v174_v4 }
  0x7a   :  { %393 = vmatprep.subr.bf16.mxu1 %v3389_v27  ;;  %2224 = vmatpush1.bf16.msra.mxu0 %v3804_v50  ;;  %v3823_v63 = vld [vmem:[#allocation11 + $0x4] ss:$16 sps:$4 sm:$0xff]   ;;  %v3825_v1 = vld [vmem:[#allocation11 + $0x200] ss:$16 sps:$4 sm:$0xff]  }
  0x7b   :  { %2225 = vmatprep.subr.bf16.mxu0 %v3805_v51  ;;  %v3828_v2 = vld [vmem:[#allocation11] ss:$16 sps:$4 sm:$0xff]  }
  0x7d   :  { %394 = vmatpush1.bf16.msra.mxu1 %v3388_v28  ;;  %v4643_v28 = vsub.s32 5, %v174_v4 }
  0x7e   :  { %432 = vmatprep.subr.bf16.mxu1 %v3399_v31  ;;  %2226 = vmatpush1.bf16.msra.mxu0 %v3810_v54  ;;  %v192_v31 = vrot.slane %v171_v6, %v4641_v24 }
  0x7f   :  { %2227 = vmatprep.subr.bf16.mxu0 %v3811_v55 }
  0x80   :  { %3402 = vmatmul.mubr.msk.bf16.vlgmr.msra.gmra.mxu1 %vm293_vm0, %v154_v15 }
  0x81   :  { %433 = vmatpush1.bf16.msra.mxu1 %v3398_v32  ;;  %452 = vmatprep.mubr.bf16.mxu1 %v4519_v0  ;;  %v3827_v0 = vld [vmem:[#allocation11 + $0x204] ss:$16 sps:$4 sm:$0xff]  }
  0x82   :  { %434 = vmatprep.subr.bf16.mxu1 %v3391_v33  ;;  %2228 = vmatpush1.bf16.msra.mxu0 %v3816_v58  ;;  %v196_v33 = vrot.slane %v171_v6, %v4643_v28 }
  0x83   :  { %2229 = vmatprep.subr.bf16.mxu0 %v3817_v59 }
  0x85   :  { %435 = vmatpush1.bf16.msra.mxu1 %v3390_v34 }
  0x86   :  { %2258 = vmatprep.subr.bf16.mxu1 %v3785_v37  ;;  %2230 = vmatpush1.bf16.msra.mxu0 %v3822_v62 }
  0x87   :  { %2231 = vmatprep.subr.bf16.mxu0 %v3823_v63 }
  0x88   :  { %3403 = vmatmul.mubr.msk.bf16.vlgmr.msra.gmra.mxu1 %vm293_vm0, %v154_v15  ;;  %v4637_v15 = vsub.s32 3, %v174_v4 }
  0x89   :  { %2259 = vmatpush1.bf16.msra.mxu1 %v3783_v36  ;;  %v4647_v36 = vsub.s32 6, %v174_v4 }
  0x8a   :  { %2260 = vmatprep.subr.bf16.mxu1 %v3791_v40  ;;  %2232 = vmatpush1.bf16.msra.mxu0 %v3828_v2  ;;  %v188_v21 = vrot.slane %v171_v6, %v4637_v15 }
  0x8b   :  { %v200_v43 = vrot.slane %v171_v6, %v4647_v36 }
  0x8d   :  { %2261 = vmatpush1.bf16.msra.mxu1 %v3789_v41  ;;  %v4649_v41 = vsub.s32 7, %v174_v4 }
  0x8e   :  { %2262 = vmatprep.subr.bf16.mxu1 %v3797_v44 }
  0x91   :  { %2263 = vmatpush1.bf16.msra.mxu1 %v3795_v45 }
  0x92   :  { %2264 = vmatprep.subr.bf16.mxu1 %v3803_v48 }
  0x95   :  { %2265 = vmatpush1.bf16.msra.mxu1 %v3801_v49  ;;  %v204_v49 = vrot.slane %v171_v6, %v4649_v41 }
  0x96   :  { %2266 = vmatprep.subr.bf16.mxu1 %v3809_v52 }
  0x99   :  { %2267 = vmatpush1.bf16.msra.mxu1 %v3807_v53 }
  0x9a   :  { %2268 = vmatprep.subr.bf16.mxu1 %v3815_v56 }
  0x9d   :  { %2269 = vmatpush1.bf16.msra.mxu1 %v3813_v57 }
  0x9e   :  { %2270 = vmatprep.subr.bf16.mxu1 %v3821_v60 }
  0xa1   :  { %2271 = vmatpush1.bf16.msra.mxu1 %v3819_v61 }
  0xa2   :  { %2272 = vmatprep.subr.bf16.mxu1 %v3827_v0 }
  0xa5   :  { %2273 = vmatpush1.bf16.msra.mxu1 %v3825_v1 }
 0x130   :  { %v331_v10 = vpop.f32.mrf.mxu1 }
 0x131   :  { %v332_v12 = vadd.f32 %v331_v10, %v176_v8 }
 0x132   :  { %v333_v13 = vpop.f32.mrf.mxu1 }
 0x133   :  { %v334_v14 = vadd.f32 %v333_v13, %v180_v9  ;;  %v469_v19 = vmul.f32 0.70710677, %v332_v12  ;;  %v461_v58 = vmul.f32 0.5, %v332_v12 }
 0x134   :  { %v335_v16 = vpop.f32.mrf.mxu1 }
 0x135   :  { %v470_v17 = vmul.f32 0.70710677, %v334_v14  ;;  %v462_v53 = vmul.f32 0.5, %v334_v14 }
 0x136   :  { %v336_v20 = vpop.f32.mrf.mxu1 }
 0x137   :  { %4277 = verf.f32 %v470_v17 }
 0x138   :  { %v372_v22 = vpop.f32.mrf.mxu1  ;;  %4279 = verf.f32 %v469_v19 }
 0x139   :  { %v373_v23 = vadd.f32 %v372_v22, %v184_v18 }
 0x13a   :  { %v374_v25 = vpop.f32.mrf.mxu1 }
 0x13b   :  { %v471_v26 = vmul.f32 0.70710677, %v373_v23  ;;  %v375_v27 = vadd.f32 %v374_v25, %v188_v21  ;;  %v463_v60 = vmul.f32 0.5, %v373_v23 }
 0x13c   :  { %v376_v29 = vpop.f32.mrf.mxu1 }
 0x13d   :  { %4281 = verf.f32 %v471_v26  ;;  %v472_v30 = vmul.f32 0.70710677, %v375_v27  ;;  %v464_v6 = vmul.f32 0.5, %v375_v27 }
 0x13e   :  { %v377_v32 = vpop.f32.mrf.mxu1 }
 0x13f   :  { %4283 = verf.f32 %v472_v30 }
 0x140   :  { %v413_v34 = vpop.f32.mrf.mxu1 }
 0x141   :  { %v414_v35 = vadd.f32 %v413_v34, %v192_v31 }
 0x142   :  { %v415_v37 = vpop.f32.mrf.mxu1 }
 0x143   :  { %v473_v38 = vmul.f32 0.70710677, %v414_v35  ;;  %v416_v39 = vadd.f32 %v415_v37, %v196_v33  ;;  %v465_v16 = vmul.f32 0.5, %v414_v35 }
 0x144   :  { %v417_v40 = vpop.f32.mrf.mxu1  ;;  %v4278_v42 = vpop.eup %4277 }
 0x145   :  { %4285 = verf.f32 %v473_v38  ;;  %v474_v44 = vmul.f32 0.70710677, %v416_v39  ;;  %v4280_v46 = vpop.eup %4279  ;;  %v486_v47 = vadd.f32 1.0, %v4278_v42  ;;  %v466_v23 = vmul.f32 0.5, %v416_v39 }
 0x146   :  { %v418_v45 = vpop.f32.mrf.mxu1  ;;  %v485_v52 = vadd.f32 1.0, %v4280_v46 }
 0x147   :  { %4287 = verf.f32 %v474_v44  ;;  %v4653_v59 = vmul.f32 %v486_v47, %v462_v53  ;;  %v3831_v53 = vld [vmem:[#allocation11 + $0x3e0] ss:$16 sps:$4 sm:$0xff]  }
 0x148   :  { %v454_v48 = vpop.f32.mrf.mxu1  ;;  %v4655_v63 = vmul.f32 %v485_v52, %v461_v58  ;;  %v3829_v52 = vld [vmem:[#allocation11 + $0x1e4] ss:$16 sps:$4 sm:$0xff]   ;;  %v3837_v58 = vld [vmem:[#allocation11 + $0x3c0] ss:$16 sps:$4 sm:$0xff]  }
 0x149   :  { %v455_v50 = vadd.f32 %v454_v48, %v200_v43  ;;  %v515_v4 = vmul.f32 %v4653_v59, %v4653_v59  ;;  %2233 = vmatprep.subr.bf16.mxu0 %v3829_v52 }
 0x14a   :  { %v4282_v51 = vpop.eup %4281  ;;  %v456_v54 = vpop.f32.mrf.mxu1  ;;  %v503_v8 = vadd.f32 %v4653_v59, %v4655_v63  ;;  %v514_v10 = vmul.f32 %v4655_v63, %v4655_v63 }
 0x14b   :  { %v487_v55 = vadd.f32 1.0, %v4282_v51  ;;  %v475_v56 = vmul.f32 0.70710677, %v455_v50  ;;  %v457_v61 = vadd.f32 %v456_v54, %v204_v49  ;;  %v467_v33 = vmul.f32 0.5, %v455_v50  ;;  %v3833_v54 = vld [vmem:[#allocation11 + $0x3e4] ss:$16 sps:$4 sm:$0xff]  }
 0x14c   :  { %v4284_v57 = vpop.eup %4283  ;;  %v458_v62 = vpop.f32.mrf.mxu1  ;;  %v522_v18 = vadd.f32 %v515_v4, %v514_v10  ;;  %2274 = vmatprep.subr.bf16.mxu1 %v3833_v54  ;;  %v3849_v4 = vld [vmem:[#allocation11 + $0x380] ss:$16 sps:$4 sm:$0xff]   ;;  %v3857_v10 = vld [vmem:[#allocation11 + $0x364] ss:$16 sps:$4 sm:$0xff]  }
 0x14d   :  { %4289 = verf.f32 %v475_v56  ;;  %v4657_v0 = vmul.f32 %v487_v55, %v463_v60  ;;  %v488_v1 = vadd.f32 1.0, %v4284_v57  ;;  %v476_v2 = vmul.f32 0.70710677, %v457_v61  ;;  %v3834_v55 = vld [vmem:[#allocation11 + $0x1e0] ss:$16 sps:$4 sm:$0xff]   ;;  %2275 = vmatpush2.bf16.msra.mxu1 %v3831_v53 }
 0x14e   :  { %v459_v3 = vpop.f32.mrf.mxu1  ;;  %v468_v42 = vmul.f32 0.5, %v457_v61  ;;  %2234 = vmatpush2.bf16.msra.mxu0 %v3834_v55  ;;  %v3835_v56 = vld [vmem:[#allocation11 + $0x1c4] ss:$16 sps:$4 sm:$0xff]   ;;  %v3840_v60 = vld [vmem:[#allocation11 + $0x1c0] ss:$16 sps:$4 sm:$0xff]  }
 0x14f   :  { %4291 = verf.f32 %v476_v2  ;;  %v516_v12 = vmul.f32 %v4657_v0, %v4657_v0  ;;  %v4667_v13 = vmul.f32 %v488_v1, %v464_v6  ;;  %v504_v14 = vadd.f32 %v503_v8, %v4657_v0  ;;  %v3839_v57 = vld [vmem:[#allocation11 + $0x3c4] ss:$16 sps:$4 sm:$0xff]   ;;  %2235 = vmatprep.subr.bf16.mxu0 %v3835_v56  ;;  %v3843_v1 = vld [vmem:[#allocation11 + $0x3a0] ss:$16 sps:$4 sm:$0xff]  }
 0x150   :  { %2276 = vmatprep.subr.bf16.mxu1 %v3839_v57  ;;  %v3841_v61 = vld [vmem:[#allocation11 + $0x1a4] ss:$16 sps:$4 sm:$0xff]   ;;  %v3846_v2 = vld [vmem:[#allocation11 + $0x1a0] ss:$16 sps:$4 sm:$0xff]  }
 0x151   :  { %v523_v21 = vadd.f32 %v522_v18, %v516_v12  ;;  %v517_v22 = vmul.f32 %v4667_v13, %v4667_v13  ;;  %v505_v26 = vadd.f32 %v504_v14, %v4667_v13  ;;  %2277 = vmatpush2.bf16.msra.mxu1 %v3837_v58  ;;  %v3845_v62 = vld [vmem:[#allocation11 + $0x3a4] ss:$16 sps:$4 sm:$0xff]   ;;  %v3852_v8 = vld [vmem:[#allocation11 + $0x180] ss:$16 sps:$4 sm:$0xff]  }
 0x152   :  { %v4286_v9 = vpop.eup %4285  ;;  %2236 = vmatpush2.bf16.msra.mxu0 %v3840_v60  ;;  %2278 = vmatprep.subr.bf16.mxu1 %v3845_v62  ;;  %v3847_v3 = vld [vmem:[#allocation11 + $0x184] ss:$16 sps:$4 sm:$0xff]   ;;  %v3855_v12 = vld [vmem:[#allocation11 + $0x360] ss:$16 sps:$4 sm:$0xff]  }
 0x153   :  { %v489_v17 = vadd.f32 1.0, %v4286_v9  ;;  %v524_v32 = vadd.f32 %v523_v21, %v517_v22  ;;  %2237 = vmatprep.subr.bf16.mxu0 %v3841_v61  ;;  %v3851_v6 = vld [vmem:[#allocation11 + $0x384] ss:$16 sps:$4 sm:$0xff]   ;;  %v3858_v14 = vld [vmem:[#allocation11 + $0x160] ss:$16 sps:$4 sm:$0xff]  }
 0x154   :  { %v4288_v19 = vpop.eup %4287  ;;  %v3853_v9 = vld [vmem:[#allocation11 + $0x164] ss:$16 sps:$4 sm:$0xff]   ;;  %v3861_v18 = vld [vmem:[#allocation11 + $0x340] ss:$16 sps:$4 sm:$0xff]  }
 0x155   :  { %v4670_v20 = vmul.f32 %v489_v17, %v465_v16  ;;  %v490_v25 = vadd.f32 1.0, %v4288_v19  ;;  %2279 = vmatpush2.bf16.msra.mxu1 %v3843_v1  ;;  %v3859_v16 = vld [vmem:[#allocation11 + $0x144] ss:$16 sps:$4 sm:$0xff]   ;;  %v3864_v19 = vld [vmem:[#allocation11 + $0x140] ss:$16 sps:$4 sm:$0xff]  }
 0x156   :  { %2238 = vmatpush2.bf16.msra.mxu0 %v3846_v2  ;;  %2280 = vmatprep.subr.bf16.mxu1 %v3851_v6  ;;  %v3863_v17 = vld [vmem:[#allocation11 + $0x344] ss:$16 sps:$4 sm:$0xff]  }
 0x157   :  { %v518_v27 = vmul.f32 %v4670_v20, %v4670_v20  ;;  %v4677_v29 = vmul.f32 %v490_v25, %v466_v23  ;;  %v506_v30 = vadd.f32 %v505_v26, %v4670_v20  ;;  %2239 = vmatprep.subr.bf16.mxu0 %v3847_v3  ;;  %v3865_v21 = vld [vmem:[#allocation11 + $0x124] ss:$16 sps:$4 sm:$0xff]   ;;  %v3867_v23 = vld [vmem:[#allocation11 + $0x320] ss:$16 sps:$4 sm:$0xff]  }
 0x158   :  { %v3869_v22 = vld [vmem:[#allocation11 + $0x324] ss:$16 sps:$4 sm:$0xff]   ;;  %v3870_v25 = vld [vmem:[#allocation11 + $0x120] ss:$16 sps:$4 sm:$0xff]  }
 0x159   :  { %v519_v35 = vmul.f32 %v4677_v29, %v4677_v29  ;;  %v525_v37 = vadd.f32 %v524_v32, %v518_v27  ;;  %v507_v40 = vadd.f32 %v506_v30, %v4677_v29  ;;  %2281 = vmatpush2.bf16.msra.mxu1 %v3849_v4  ;;  %v3871_v26 = vld [vmem:[#allocation11 + $0x104] ss:$16 sps:$4 sm:$0xff]   ;;  %v3873_v30 = vld [vmem:[#allocation11 + $0x300] ss:$16 sps:$4 sm:$0xff]  }
 0x15a   :  { %v4290_v31 = vpop.eup %4289  ;;  %2240 = vmatpush2.bf16.msra.mxu0 %v3852_v8  ;;  %2282 = vmatprep.subr.bf16.mxu1 %v3857_v10  ;;  %v3875_v27 = vld [vmem:[#allocation11 + $0x304] ss:$16 sps:$4 sm:$0xff]  }
 0x15b   :  { %v491_v34 = vadd.f32 1.0, %v4290_v31  ;;  %v526_v47 = vadd.f32 %v525_v37, %v519_v35  ;;  %2241 = vmatprep.subr.bf16.mxu0 %v3853_v9  ;;  %v3876_v31 = vld [vmem:[#allocation11 + $0x100] ss:$16 sps:$4 sm:$0xff]   ;;  %v3879_v32 = vld [vmem:[#allocation11 + $0x4e4] ss:$16 sps:$4 sm:$0xff]  }
 0x15c   :  { %v4292_v38 = vpop.eup %4291 }
 0x15d   :  { %v4682_v39 = vmul.f32 %v491_v34, %v467_v33  ;;  %v492_v43 = vadd.f32 1.0, %v4292_v38  ;;  %2283 = vmatpush2.bf16.msra.mxu1 %v3855_v12  ;;  %v3882_v33 = vld [vmem:[#allocation11 + $0x6e4] ss:$16 sps:$4 sm:$0xff]  }
 0x15e   :  { %2242 = vmatpush2.bf16.msra.mxu0 %v3858_v14  ;;  %2284 = vmatprep.subr.bf16.mxu1 %v3863_v17 }
 0x15f   :  { %v508_v44 = vadd.f32 %v507_v40, %v4682_v39  ;;  %v520_v45 = vmul.f32 %v4682_v39, %v4682_v39  ;;  %v4688_v46 = vmul.f32 %v492_v43, %v468_v42  ;;  %2243 = vmatprep.subr.bf16.mxu0 %v3859_v16 }
 0x161   :  { %v509_v48 = vadd.f32 %v508_v44, %v4688_v46  ;;  %v521_v49 = vmul.f32 %v4688_v46, %v4688_v46  ;;  %v527_v50 = vadd.f32 %v526_v47, %v520_v45  ;;  %2285 = vmatpush2.bf16.msra.mxu1 %v3861_v18  ;;  %v501_v45 = vld [vmem:[#allocation8] sm:$0xff]  ;;  %v502_v47 = vld [vmem:[#allocation10] sm:$0xff] }
 0x162   :  { %2244 = vmatpush2.bf16.msra.mxu0 %v3864_v19  ;;  %2286 = vmatprep.subr.bf16.mxu1 %v3869_v22  ;;  %v557_v52 = vrot.slane %v501_v45, %v4629_v5  ;;  %v565_v53 = vrot.slane %v501_v45, %v4635_v11  ;;  %v577_v54 = vrot.slane %v501_v45, %v4643_v28 }
 0x163   :  { %510 = vadd.xlane.f32.xlu0 %v509_v48  ;;  %v528_v51 = vadd.f32 %v527_v50, %v521_v49  ;;  %2245 = vmatprep.subr.bf16.mxu0 %v3865_v21  ;;  %v573_v48 = vrot.slane %v501_v45, %v4641_v24  ;;  %v581_v49 = vrot.slane %v501_v45, %v4647_v36 }
 0x164   :  { %v561_v50 = vrot.slane %v501_v45, %v4631_v7  ;;  %v585_v55 = vrot.slane %v501_v45, %v4649_v41  ;;  %v610_v56 = vrot.slane %v502_v47, %v4631_v7  ;;  %v618_v57 = vrot.slane %v502_v47, %v4637_v15 }
 0x165   :  { %2287 = vmatpush2.bf16.msra.mxu1 %v3867_v23  ;;  %v606_v58 = vrot.slane %v502_v47, %v4629_v5  ;;  %v614_v60 = vrot.slane %v502_v47, %v4635_v11  ;;  %v626_v61 = vrot.slane %v502_v47, %v4643_v28  ;;  %v634_v62 = vrot.slane %v502_v47, %v4649_v41 }
 0x166   :  { %2246 = vmatpush2.bf16.msra.mxu0 %v3870_v25  ;;  %2288 = vmatprep.subr.bf16.mxu1 %v3875_v27  ;;  %v622_v1 = vrot.slane %v502_v47, %v4641_v24  ;;  %v630_v2 = vrot.slane %v502_v47, %v4647_v36  ;;  %v3883_v47 = vld [vmem:[#allocation11 + $0x4c0] ss:$16 sps:$4 sm:$0xff]  }
 0x167   :  { %529 = vadd.xlane.f32.xlu0 %v528_v51  ;;  %2247 = vmatprep.subr.bf16.mxu0 %v3871_v26  ;;  %v569_v51 = vrot.slane %v501_v45, %v4637_v15 }
 0x169   :  { %2289 = vmatpush2.bf16.msra.mxu1 %v3873_v30 }
 0x16a   :  { %2248 = vmatpush2.bf16.msra.mxu0 %v3876_v31  ;;  %2340 = vmatprep.subr.bf16.mxu1 %v3882_v33 }
 0x16b   :  { %2299 = vmatprep.subr.bf16.mxu0 %v3879_v32 }
 0x1ec   :  { %v511_v34 = vpop.xlane.xlu0 %510 }
 0x1ed   :  { %v513_v35 = vmul.f32 0.0009765625, %v511_v34 }
 0x1ef   :  { %v532_v38 = vmul.f32 %v513_v35, %v513_v35  ;;  %v536_v3 = vsub.f32 %v4653_v59, %v513_v35  ;;  %v538_v4 = vsub.f32 %v4667_v13, %v513_v35  ;;  %v535_v6 = vsub.f32 %v4655_v63, %v513_v35 }
 0x1f0   :  { %v530_v37 = vpop.xlane.xlu0 %529  ;;  %v537_v8 = vsub.f32 %v4657_v0, %v513_v35  ;;  %v540_v10 = vsub.f32 %v4677_v29, %v513_v35  ;;  %v542_v12 = vsub.f32 %v4688_v46, %v513_v35  ;;  %v539_v28 = vsub.f32 %v4670_v20, %v513_v35 }
 0x1f1   :  { %v531_v40 = vmul.f32 0.0009765625, %v530_v37  ;;  %v541_v41 = vsub.f32 %v4682_v39, %v513_v35  ;;  %v3877_v35 = vld [vmem:[#allocation11 + $0x4e0] ss:$16 sps:$4 sm:$0xff]  }
 0x1f2   :  { %v3880_v37 = vld [vmem:[#allocation11 + $0x6e0] ss:$16 sps:$4 sm:$0xff]  }
 0x1f3   :  { %v533_v42 = vsub.f32 %v531_v40, %v532_v38 }
 0x1f5   :  { %v534_v43 = vmax.f32 %v533_v42, 0.0  ;;  %v3885_v42 = vld [vmem:[#allocation11 + $0x4c4] ss:$16 sps:$4 sm:$0xff]  }
 0x1f7   :  { %v543_v44 = vadd.f32 1e-05, %v534_v43  ;;  %v3888_v43 = vld [vmem:[#allocation11 + $0x6c4] ss:$16 sps:$4 sm:$0xff]  }
 0x1f9   :  { %4293 = vrsqrt.f32 %v543_v44 }
 0x206   :  { %v4294_v9 = vpop.eup %4293 }
 0x207   :  { %v546_v24 = vmul.f32 %v4294_v9, %v536_v3  ;;  %v548_v14 = vmul.f32 %v4294_v9, %v538_v4  ;;  %v545_v36 = vmul.f32 %v4294_v9, %v535_v6  ;;  %v547_v16 = vmul.f32 %v4294_v9, %v537_v8  ;;  %v3910_v3 = vld [vmem:[#allocation11 + $0x640] ss:$16 sps:$4 sm:$0xff]   ;;  %v3915_v4 = vld [vmem:[#allocation11 + $0x424] ss:$16 sps:$4 sm:$0xff]  }
 0x208   :  { %v550_v59 = vmul.f32 %v4294_v9, %v540_v10  ;;  %v552_v17 = vmul.f32 %v4294_v9, %v542_v12  ;;  %v549_v13 = vmul.f32 %v4294_v9, %v539_v28  ;;  %v551_v18 = vmul.f32 %v4294_v9, %v541_v41  ;;  %v3918_v6 = vld [vmem:[#allocation11 + $0x624] ss:$16 sps:$4 sm:$0xff]   ;;  %v3913_v8 = vld [vmem:[#allocation11 + $0x420] ss:$16 sps:$4 sm:$0xff]  }
 0x209   :  { %v595_v63 = vmul.f32 %v561_v50, %v546_v24  ;;  %v597_v19 = vmul.f32 %v569_v51, %v548_v14  ;;  %v594_v0 = vmul.f32 %v557_v52, %v545_v36  ;;  %v596_v21 = vmul.f32 %v565_v53, %v547_v16  ;;  %v3894_v50 = vld [vmem:[#allocation11 + $0x6a4] ss:$16 sps:$4 sm:$0xff]   ;;  %v3889_v51 = vld [vmem:[#allocation11 + $0x4a0] ss:$16 sps:$4 sm:$0xff]  }
 0x20a   :  { %v599_v22 = vmul.f32 %v577_v54, %v550_v59  ;;  %v601_v29 = vmul.f32 %v585_v55, %v552_v17  ;;  %v598_v23 = vmul.f32 %v573_v48, %v549_v13  ;;  %v600_v46 = vmul.f32 %v581_v49, %v551_v18  ;;  %v3886_v48 = vld [vmem:[#allocation11 + $0x6c0] ss:$16 sps:$4 sm:$0xff]   ;;  %v3891_v49 = vld [vmem:[#allocation11 + $0x4a4] ss:$16 sps:$4 sm:$0xff]  }
 0x20b   :  { %v644_v25 = vadd.f32 %v610_v56, %v595_v63  ;;  %v646_v20 = vadd.f32 %v618_v57, %v597_v19  ;;  %v643_v26 = vadd.f32 %v606_v58, %v594_v0  ;;  %v645_v39 = vadd.f32 %v614_v60, %v596_v21  ;;  %v3892_v52 = vld [vmem:[#allocation11 + $0x6a0] ss:$16 sps:$4 sm:$0xff]   ;;  %v3897_v53 = vld [vmem:[#allocation11 + $0x484] ss:$16 sps:$4 sm:$0xff]  }
 0x20c   :  { %v648_v27 = vadd.f32 %v626_v61, %v599_v22  ;;  %v650_v30 = vadd.f32 %v634_v62, %v601_v29  ;;  %v4717_v31 = vadd.f32 %v622_v1, %v598_v23  ;;  %v4719_v32 = vadd.f32 %v630_v2, %v600_v46  ;;  %v3900_v54 = vld [vmem:[#allocation11 + $0x684] ss:$16 sps:$4 sm:$0xff]   ;;  %v3895_v55 = vld [vmem:[#allocation11 + $0x480] ss:$16 sps:$4 sm:$0xff]  }
 0x20d   :  { %v4721_v33 = vpack.c.bf16 %v644_v25, %v644_v25  ;;  %v4723_v34 = vpack.c.bf16 %v646_v20, %v646_v20  ;;  %v4725_v38 = vpack.c.bf16 %v643_v26, %v643_v26  ;;  %v4727_v40 = vpack.c.bf16 %v645_v39, %v645_v39  ;;  %v3898_v56 = vld [vmem:[#allocation11 + $0x680] ss:$16 sps:$4 sm:$0xff]   ;;  %v3903_v57 = vld [vmem:[#allocation11 + $0x464] ss:$16 sps:$4 sm:$0xff]  }
 0x20e   :  { %v4733_v44 = vpack.c.bf16 %v648_v27, %v648_v27  ;;  %v4735_v45 = vpack.c.bf16 %v650_v30, %v650_v30  ;;  %v3906_v58 = vld [vmem:[#allocation11 + $0x664] ss:$16 sps:$4 sm:$0xff]   ;;  %v3901_v60 = vld [vmem:[#allocation11 + $0x460] ss:$16 sps:$4 sm:$0xff]  }
 0x20f   :  { %2249 = vmatprep.mubr.bf16.mxu0 %v4721_v33  ;;  %2290 = vmatprep.mubr.bf16.mxu1 %v4723_v34  ;;  %v3904_v61 = vld [vmem:[#allocation11 + $0x660] ss:$16 sps:$4 sm:$0xff]   ;;  %v3909_v62 = vld [vmem:[#allocation11 + $0x444] ss:$16 sps:$4 sm:$0xff]  }
 0x210   :  { %2250 = vmatmul.mubr.bf16.vlgmr.msra.gmra.mxu0 %v4725_v38  ;;  %2291 = vmatmul.mubr.bf16.vlgmr.msra.gmra.mxu1 %v4727_v40  ;;  %v3912_v1 = vld [vmem:[#allocation11 + $0x644] ss:$16 sps:$4 sm:$0xff]   ;;  %v3907_v2 = vld [vmem:[#allocation11 + $0x440] ss:$16 sps:$4 sm:$0xff]  }
 0x211   :  { %2300 = vmatpush1.bf16.msra.mxu0 %v3877_v35  ;;  %2341 = vmatpush1.bf16.msra.mxu1 %v3880_v37  ;;  %v3916_v9 = vld [vmem:[#allocation11 + $0x620] ss:$16 sps:$4 sm:$0xff]   ;;  %v3921_v10 = vld [vmem:[#allocation11 + $0x404] ss:$16 sps:$4 sm:$0xff]  }
 0x212   :  { %2331 = vmatprep.mubr.bf16.mxu0 %v4733_v44  ;;  %2372 = vmatprep.mubr.bf16.mxu1 %v4735_v45  ;;  %v3924_v12 = vld [vmem:[#allocation11 + $0x604] ss:$16 sps:$4 sm:$0xff]   ;;  %v3919_v28 = vld [vmem:[#allocation11 + $0x400] ss:$16 sps:$4 sm:$0xff]  }
 0x213   :  { %2301 = vmatprep.subr.bf16.mxu0 %v3885_v42  ;;  %2342 = vmatprep.subr.bf16.mxu1 %v3888_v43  ;;  %v3922_v41 = vld [vmem:[#allocation11 + $0x600] ss:$16 sps:$4 sm:$0xff]   ;;  %v3927_v24 = vld [vmem:[#allocation11 + $0x5e4] ss:$16 sps:$4 sm:$0xff]  }
 0x214   :  { %v3930_v14 = vld [vmem:[#allocation11 + $0x7e4] ss:$16 sps:$4 sm:$0xff]   ;;  %v3925_v36 = vld [vmem:[#allocation11 + $0x5e0] ss:$16 sps:$4 sm:$0xff]  }
 0x215   :  { %2302 = vmatpush1.bf16.msra.mxu0 %v3883_v47  ;;  %2343 = vmatpush1.bf16.msra.mxu1 %v3886_v48  ;;  %v3928_v16 = vld [vmem:[#allocation11 + $0x7e0] ss:$16 sps:$4 sm:$0xff]   ;;  %v3933_v59 = vld [vmem:[#allocation11 + $0x5c4] ss:$16 sps:$4 sm:$0xff]  }
 0x216   :  { %2303 = vmatprep.subr.bf16.mxu0 %v3891_v49  ;;  %2344 = vmatprep.subr.bf16.mxu1 %v3894_v50  ;;  %v3936_v17 = vld [vmem:[#allocation11 + $0x7c4] ss:$16 sps:$4 sm:$0xff]   ;;  %v3931_v13 = vld [vmem:[#allocation11 + $0x5c0] ss:$16 sps:$4 sm:$0xff]  }
 0x217   :  { %v3934_v18 = vld [vmem:[#allocation11 + $0x7c0] ss:$16 sps:$4 sm:$0xff]   ;;  %v3939_v63 = vld [vmem:[#allocation11 + $0x5a4] ss:$16 sps:$4 sm:$0xff]  }
 0x218   :  { %v3942_v19 = vld [vmem:[#allocation11 + $0x7a4] ss:$16 sps:$4 sm:$0xff]   ;;  %v3937_v0 = vld [vmem:[#allocation11 + $0x5a0] ss:$16 sps:$4 sm:$0xff]  }
 0x219   :  { %2304 = vmatpush1.bf16.msra.mxu0 %v3889_v51  ;;  %2345 = vmatpush1.bf16.msra.mxu1 %v3892_v52  ;;  %v3940_v21 = vld [vmem:[#allocation11 + $0x7a0] ss:$16 sps:$4 sm:$0xff]   ;;  %v3945_v22 = vld [vmem:[#allocation11 + $0x584] ss:$16 sps:$4 sm:$0xff]  }
 0x21a   :  { %2305 = vmatprep.subr.bf16.mxu0 %v3897_v53  ;;  %2346 = vmatprep.subr.bf16.mxu1 %v3900_v54  ;;  %v3948_v29 = vld [vmem:[#allocation11 + $0x784] ss:$16 sps:$4 sm:$0xff]   ;;  %v3943_v23 = vld [vmem:[#allocation11 + $0x580] ss:$16 sps:$4 sm:$0xff]   ;;  %v3975_v53 = vld [vmem:[#allocation11 + $0xec] ss:$16 sps:$4 sm:$0xff]  }
 0x21b   :  { %v3946_v46 = vld [vmem:[#allocation11 + $0x780] ss:$16 sps:$4 sm:$0xff]   ;;  %v3951_v25 = vld [vmem:[#allocation11 + $0x564] ss:$16 sps:$4 sm:$0xff]   ;;  %v3978_v54 = vld [vmem:[#allocation11 + $0x2ec] ss:$16 sps:$4 sm:$0xff]  }
 0x21c   :  { %v3954_v20 = vld [vmem:[#allocation11 + $0x764] ss:$16 sps:$4 sm:$0xff]   ;;  %v3949_v26 = vld [vmem:[#allocation11 + $0x560] ss:$16 sps:$4 sm:$0xff]  }
 0x21d   :  { %2306 = vmatpush1.bf16.msra.mxu0 %v3895_v55  ;;  %2347 = vmatpush1.bf16.msra.mxu1 %v3898_v56  ;;  %v3952_v39 = vld [vmem:[#allocation11 + $0x760] ss:$16 sps:$4 sm:$0xff]   ;;  %v3957_v27 = vld [vmem:[#allocation11 + $0x544] ss:$16 sps:$4 sm:$0xff]   ;;  %v3973_v55 = vld [vmem:[#allocation11 + $0xe8] ss:$16 sps:$4 sm:$0xff]   ;;  %v4741_v56 = vpack.c.bf16 %v4717_v31, %v4717_v31 }
 0x21e   :  { %2307 = vmatprep.subr.bf16.mxu0 %v3903_v57  ;;  %2348 = vmatprep.subr.bf16.mxu1 %v3906_v58  ;;  %v3960_v30 = vld [vmem:[#allocation11 + $0x744] ss:$16 sps:$4 sm:$0xff]   ;;  %v3955_v35 = vld [vmem:[#allocation11 + $0x540] ss:$16 sps:$4 sm:$0xff]   ;;  %v4745_v57 = vpack.c.bf16 %v4719_v32, %v4719_v32  ;;  %v3976_v58 = vld [vmem:[#allocation11 + $0x2e8] ss:$16 sps:$4 sm:$0xff]  }
 0x21f   :  { %v3958_v37 = vld [vmem:[#allocation11 + $0x740] ss:$16 sps:$4 sm:$0xff]   ;;  %v3963_v42 = vld [vmem:[#allocation11 + $0x524] ss:$16 sps:$4 sm:$0xff]   ;;  %v3982_v31 = vld [vmem:[#allocation11 + $0x2c8] ss:$16 sps:$4 sm:$0xff]  }
 0x220   :  { %v3966_v43 = vld [vmem:[#allocation11 + $0x724] ss:$16 sps:$4 sm:$0xff]   ;;  %v3961_v47 = vld [vmem:[#allocation11 + $0x520] ss:$16 sps:$4 sm:$0xff]   ;;  %v3990_v32 = vld [vmem:[#allocation11 + $0x2ac] ss:$16 sps:$4 sm:$0xff]  }
 0x221   :  { %2308 = vmatpush1.bf16.msra.mxu0 %v3901_v60  ;;  %2349 = vmatpush1.bf16.msra.mxu1 %v3904_v61  ;;  %v3964_v48 = vld [vmem:[#allocation11 + $0x720] ss:$16 sps:$4 sm:$0xff]   ;;  %v3969_v49 = vld [vmem:[#allocation11 + $0x504] ss:$16 sps:$4 sm:$0xff]   ;;  %v3981_v60 = vld [vmem:[#allocation11 + $0xcc] ss:$16 sps:$4 sm:$0xff]  }
 0x222   :  { %2309 = vmatprep.subr.bf16.mxu0 %v3909_v62  ;;  %2350 = vmatprep.subr.bf16.mxu1 %v3912_v1  ;;  %v3972_v50 = vld [vmem:[#allocation11 + $0x704] ss:$16 sps:$4 sm:$0xff]   ;;  %v3967_v51 = vld [vmem:[#allocation11 + $0x500] ss:$16 sps:$4 sm:$0xff]   ;;  %v3984_v61 = vld [vmem:[#allocation11 + $0x2cc] ss:$16 sps:$4 sm:$0xff]  }
 0x223   :  { %v3970_v52 = vld [vmem:[#allocation11 + $0x700] ss:$16 sps:$4 sm:$0xff]   ;;  %v3979_v62 = vld [vmem:[#allocation11 + $0xc8] ss:$16 sps:$4 sm:$0xff]   ;;  %v3987_v1 = vld [vmem:[#allocation11 + $0xac] ss:$16 sps:$4 sm:$0xff]  }
 0x225   :  { %2310 = vmatpush1.bf16.msra.mxu0 %v3907_v2  ;;  %2351 = vmatpush1.bf16.msra.mxu1 %v3910_v3  ;;  %v3985_v2 = vld [vmem:[#allocation11 + $0xa8] ss:$16 sps:$4 sm:$0xff]  }
 0x226   :  { %2311 = vmatprep.subr.bf16.mxu0 %v3915_v4  ;;  %2352 = vmatprep.subr.bf16.mxu1 %v3918_v6  ;;  %v3988_v3 = vld [vmem:[#allocation11 + $0x2a8] ss:$16 sps:$4 sm:$0xff]   ;;  %v3993_v4 = vld [vmem:[#allocation11 + $0x8c] ss:$16 sps:$4 sm:$0xff]  }
 0x227   :  { %v3996_v6 = vld [vmem:[#allocation11 + $0x28c] ss:$16 sps:$4 sm:$0xff]  }
 0x229   :  { %2312 = vmatpush1.bf16.msra.mxu0 %v3913_v8  ;;  %2353 = vmatpush1.bf16.msra.mxu1 %v3916_v9  ;;  %v3991_v8 = vld [vmem:[#allocation11 + $0x88] ss:$16 sps:$4 sm:$0xff]   ;;  %v3999_v9 = vld [vmem:[#allocation11 + $0x6c] ss:$16 sps:$4 sm:$0xff]  }
 0x22a   :  { %2313 = vmatprep.subr.bf16.mxu0 %v3921_v10  ;;  %2354 = vmatprep.subr.bf16.mxu1 %v3924_v12  ;;  %v3997_v10 = vld [vmem:[#allocation11 + $0x68] ss:$16 sps:$4 sm:$0xff]  }
 0x22b   :  { %v4000_v12 = vld [vmem:[#allocation11 + $0x268] ss:$16 sps:$4 sm:$0xff]  }
 0x22d   :  { %2314 = vmatpush1.bf16.msra.mxu0 %v3919_v28  ;;  %2355 = vmatpush1.bf16.msra.mxu1 %v3922_v41  ;;  %v4005_v28 = vld [vmem:[#allocation11 + $0x4c] ss:$16 sps:$4 sm:$0xff]  }
 0x22e   :  { %2315 = vmatprep.subr.bf16.mxu0 %v3927_v24  ;;  %2356 = vmatprep.subr.bf16.mxu1 %v3930_v14  ;;  %v4008_v41 = vld [vmem:[#allocation11 + $0x24c] ss:$16 sps:$4 sm:$0xff]   ;;  %v4003_v24 = vld [vmem:[#allocation11 + $0x48] ss:$16 sps:$4 sm:$0xff]  }
 0x22f   :  { %v4006_v14 = vld [vmem:[#allocation11 + $0x248] ss:$16 sps:$4 sm:$0xff]  }
 0x231   :  { %2316 = vmatpush2.bf16.msra.mxu0 %v3925_v36  ;;  %2357 = vmatpush2.bf16.msra.mxu1 %v3928_v16  ;;  %v4011_v36 = vld [vmem:[#allocation11 + $0x2c] ss:$16 sps:$4 sm:$0xff]  }
 0x232   :  { %2317 = vmatprep.subr.bf16.mxu0 %v3933_v59  ;;  %2358 = vmatprep.subr.bf16.mxu1 %v3936_v17  ;;  %v4014_v16 = vld [vmem:[#allocation11 + $0x22c] ss:$16 sps:$4 sm:$0xff]   ;;  %v4009_v59 = vld [vmem:[#allocation11 + $0x28] ss:$16 sps:$4 sm:$0xff]  }
 0x233   :  { %v4012_v17 = vld [vmem:[#allocation11 + $0x228] ss:$16 sps:$4 sm:$0xff]  }
 0x235   :  { %2318 = vmatpush2.bf16.msra.mxu0 %v3931_v13  ;;  %2359 = vmatpush2.bf16.msra.mxu1 %v3934_v18  ;;  %v4017_v13 = vld [vmem:[#allocation11 + $0xc] ss:$16 sps:$4 sm:$0xff]  }
 0x236   :  { %2319 = vmatprep.subr.bf16.mxu0 %v3939_v63  ;;  %2360 = vmatprep.subr.bf16.mxu1 %v3942_v19  ;;  %v4020_v18 = vld [vmem:[#allocation11 + $0x20c] ss:$16 sps:$4 sm:$0xff]   ;;  %v4015_v63 = vld [vmem:[#allocation11 + $0x8] ss:$16 sps:$4 sm:$0xff]  }
 0x237   :  { %v4018_v19 = vld [vmem:[#allocation11 + $0x208] ss:$16 sps:$4 sm:$0xff]  }
 0x239   :  { %2320 = vmatpush2.bf16.msra.mxu0 %v3937_v0  ;;  %2361 = vmatpush2.bf16.msra.mxu1 %v3940_v21  ;;  %v4023_v0 = vld [vmem:[#allocation11 + $0x1ec] ss:$16 sps:$4 sm:$0xff]  }
 0x23a   :  { %2321 = vmatprep.subr.bf16.mxu0 %v3945_v22  ;;  %2362 = vmatprep.subr.bf16.mxu1 %v3948_v29  ;;  %v4026_v21 = vld [vmem:[#allocation11 + $0x3ec] ss:$16 sps:$4 sm:$0xff]   ;;  %v4021_v22 = vld [vmem:[#allocation11 + $0x1e8] ss:$16 sps:$4 sm:$0xff]  }
 0x23b   :  { %v4024_v29 = vld [vmem:[#allocation11 + $0x3e8] ss:$16 sps:$4 sm:$0xff]  }
 0x23d   :  { %2322 = vmatpush2.bf16.msra.mxu0 %v3943_v23  ;;  %2363 = vmatpush2.bf16.msra.mxu1 %v3946_v46  ;;  %v4029_v23 = vld [vmem:[#allocation11 + $0x1cc] ss:$16 sps:$4 sm:$0xff]  }
 0x23e   :  { %2323 = vmatprep.subr.bf16.mxu0 %v3951_v25  ;;  %2364 = vmatprep.subr.bf16.mxu1 %v3954_v20  ;;  %v4032_v46 = vld [vmem:[#allocation11 + $0x3cc] ss:$16 sps:$4 sm:$0xff]   ;;  %v4027_v25 = vld [vmem:[#allocation11 + $0x1c8] ss:$16 sps:$4 sm:$0xff]  }
 0x23f   :  { %v4030_v20 = vld [vmem:[#allocation11 + $0x3c8] ss:$16 sps:$4 sm:$0xff]  }
 0x241   :  { %2324 = vmatpush2.bf16.msra.mxu0 %v3949_v26  ;;  %2365 = vmatpush2.bf16.msra.mxu1 %v3952_v39  ;;  %v4035_v26 = vld [vmem:[#allocation11 + $0x1ac] ss:$16 sps:$4 sm:$0xff]  }
 0x242   :  { %2325 = vmatprep.subr.bf16.mxu0 %v3957_v27  ;;  %2366 = vmatprep.subr.bf16.mxu1 %v3960_v30  ;;  %v4038_v39 = vld [vmem:[#allocation11 + $0x3ac] ss:$16 sps:$4 sm:$0xff]   ;;  %v4033_v27 = vld [vmem:[#allocation11 + $0x1a8] ss:$16 sps:$4 sm:$0xff]  }
 0x243   :  { %v4036_v30 = vld [vmem:[#allocation11 + $0x3a8] ss:$16 sps:$4 sm:$0xff]  }
 0x245   :  { %2326 = vmatpush2.bf16.msra.mxu0 %v3955_v35  ;;  %2367 = vmatpush2.bf16.msra.mxu1 %v3958_v37  ;;  %v4041_v35 = vld [vmem:[#allocation11 + $0x18c] ss:$16 sps:$4 sm:$0xff]  }
 0x246   :  { %2327 = vmatprep.subr.bf16.mxu0 %v3963_v42  ;;  %2368 = vmatprep.subr.bf16.mxu1 %v3966_v43  ;;  %v4044_v37 = vld [vmem:[#allocation11 + $0x38c] ss:$16 sps:$4 sm:$0xff]   ;;  %v4039_v42 = vld [vmem:[#allocation11 + $0x188] ss:$16 sps:$4 sm:$0xff]  }
 0x247   :  { %v4042_v43 = vld [vmem:[#allocation11 + $0x388] ss:$16 sps:$4 sm:$0xff]  }
 0x249   :  { %2328 = vmatpush2.bf16.msra.mxu0 %v3961_v47  ;;  %2369 = vmatpush2.bf16.msra.mxu1 %v3964_v48  ;;  %v4047_v47 = vld [vmem:[#allocation11 + $0x16c] ss:$16 sps:$4 sm:$0xff]  }
 0x24a   :  { %2329 = vmatprep.subr.bf16.mxu0 %v3969_v49  ;;  %2370 = vmatprep.subr.bf16.mxu1 %v3972_v50  ;;  %v4050_v48 = vld [vmem:[#allocation11 + $0x36c] ss:$16 sps:$4 sm:$0xff]   ;;  %v4045_v49 = vld [vmem:[#allocation11 + $0x168] ss:$16 sps:$4 sm:$0xff]  }
 0x24b   :  { %v4048_v50 = vld [vmem:[#allocation11 + $0x368] ss:$16 sps:$4 sm:$0xff]  }
 0x24d   :  { %2330 = vmatpush2.bf16.msra.mxu0 %v3967_v51  ;;  %2371 = vmatpush2.bf16.msra.mxu1 %v3970_v52  ;;  %v4053_v51 = vld [vmem:[#allocation11 + $0x14c] ss:$16 sps:$4 sm:$0xff]  }
 0x24e   :  { %2381 = vmatprep.subr.bf16.mxu0 %v3975_v53  ;;  %2422 = vmatprep.subr.bf16.mxu1 %v3978_v54  ;;  %v4056_v52 = vld [vmem:[#allocation11 + $0x34c] ss:$16 sps:$4 sm:$0xff]   ;;  %v4051_v53 = vld [vmem:[#allocation11 + $0x148] ss:$16 sps:$4 sm:$0xff]  }
 0x24f   :  { %v4054_v54 = vld [vmem:[#allocation11 + $0x348] ss:$16 sps:$4 sm:$0xff]  }
 0x250   :  { %2332 = vmatmul.mubr.bf16.vlgmr.msra.gmra.mxu0 %v4741_v56  ;;  %2373 = vmatmul.mubr.bf16.vlgmr.msra.gmra.mxu1 %v4745_v57 }
 0x251   :  { %2382 = vmatpush1.bf16.msra.mxu0 %v3973_v55  ;;  %2413 = vmatprep.mubr.bf16.mxu0 %v4721_v33  ;;  %v3994_v33 = vld [vmem:[#allocation11 + $0x288] ss:$16 sps:$4 sm:$0xff]   ;;  %v4059_v55 = vld [vmem:[#allocation11 + $0x12c] ss:$16 sps:$4 sm:$0xff]  }
 0x252   :  { %2423 = vmatpush1.bf16.msra.mxu1 %v3976_v58  ;;  %2454 = vmatprep.mubr.bf16.mxu1 %v4723_v34  ;;  %v4002_v34 = vld [vmem:[#allocation11 + $0x26c] ss:$16 sps:$4 sm:$0xff]  }
 0x253   :  { %2383 = vmatprep.subr.bf16.mxu0 %v3981_v60  ;;  %2424 = vmatprep.subr.bf16.mxu1 %v3984_v61  ;;  %v4062_v58 = vld [vmem:[#allocation11 + $0x32c] ss:$16 sps:$4 sm:$0xff]   ;;  %v4057_v60 = vld [vmem:[#allocation11 + $0x128] ss:$16 sps:$4 sm:$0xff]  }
 0x254   :  { %v4060_v61 = vld [vmem:[#allocation11 + $0x328] ss:$16 sps:$4 sm:$0xff]  }
 0x255   :  { %2384 = vmatpush1.bf16.msra.mxu0 %v3979_v62  ;;  %v4065_v62 = vld [vmem:[#allocation11 + $0x10c] ss:$16 sps:$4 sm:$0xff]  }
 0x256   :  { %2425 = vmatpush1.bf16.msra.mxu1 %v3982_v31  ;;  %2385 = vmatprep.subr.bf16.mxu0 %v3987_v1  ;;  %v4068_v31 = vld [vmem:[#allocation11 + $0x30c] ss:$16 sps:$4 sm:$0xff]   ;;  %v4063_v1 = vld [vmem:[#allocation11 + $0x108] ss:$16 sps:$4 sm:$0xff]  }
 0x257   :  { %2426 = vmatprep.subr.bf16.mxu1 %v3990_v32  ;;  %v4066_v32 = vld [vmem:[#allocation11 + $0x308] ss:$16 sps:$4 sm:$0xff]  }
 0x259   :  { %2386 = vmatpush1.bf16.msra.mxu0 %v3985_v2  ;;  %v4071_v2 = vld [vmem:[#allocation11 + $0x4ec] ss:$16 sps:$4 sm:$0xff]  }
 0x25a   :  { %2427 = vmatpush1.bf16.msra.mxu1 %v3988_v3  ;;  %2387 = vmatprep.subr.bf16.mxu0 %v3993_v4  ;;  %v4074_v3 = vld [vmem:[#allocation11 + $0x6ec] ss:$16 sps:$4 sm:$0xff]   ;;  %v4069_v4 = vld [vmem:[#allocation11 + $0x4e8] ss:$16 sps:$4 sm:$0xff]  }
 0x25b   :  { %2428 = vmatprep.subr.bf16.mxu1 %v3996_v6  ;;  %v4072_v6 = vld [vmem:[#allocation11 + $0x6e8] ss:$16 sps:$4 sm:$0xff]  }
 0x25d   :  { %2388 = vmatpush1.bf16.msra.mxu0 %v3991_v8  ;;  %v4077_v8 = vld [vmem:[#allocation11 + $0x4cc] ss:$16 sps:$4 sm:$0xff]  }
 0x25e   :  { %2429 = vmatpush1.bf16.msra.mxu1 %v3994_v33  ;;  %2389 = vmatprep.subr.bf16.mxu0 %v3999_v9  ;;  %v4080_v33 = vld [vmem:[#allocation11 + $0x6cc] ss:$16 sps:$4 sm:$0xff]   ;;  %v4075_v9 = vld [vmem:[#allocation11 + $0x4c8] ss:$16 sps:$4 sm:$0xff]  }
 0x25f   :  { %2430 = vmatprep.subr.bf16.mxu1 %v4002_v34  ;;  %v4078_v34 = vld [vmem:[#allocation11 + $0x6c8] ss:$16 sps:$4 sm:$0xff]  }
 0x261   :  { %2390 = vmatpush1.bf16.msra.mxu0 %v3997_v10  ;;  %v4083_v10 = vld [vmem:[#allocation11 + $0x4ac] ss:$16 sps:$4 sm:$0xff]  }
 0x262   :  { %2431 = vmatpush1.bf16.msra.mxu1 %v4000_v12  ;;  %2391 = vmatprep.subr.bf16.mxu0 %v4005_v28  ;;  %v4086_v12 = vld [vmem:[#allocation11 + $0x6ac] ss:$16 sps:$4 sm:$0xff]   ;;  %v4081_v28 = vld [vmem:[#allocation11 + $0x4a8] ss:$16 sps:$4 sm:$0xff]  }
 0x263   :  { %2432 = vmatprep.subr.bf16.mxu1 %v4008_v41  ;;  %v4089_v41 = vld [vmem:[#allocation11 + $0x48c] ss:$16 sps:$4 sm:$0xff]  }
 0x265   :  { %2392 = vmatpush1.bf16.msra.mxu0 %v4003_v24  ;;  %v4087_v24 = vld [vmem:[#allocation11 + $0x488] ss:$16 sps:$4 sm:$0xff]  }
 0x266   :  { %2433 = vmatpush1.bf16.msra.mxu1 %v4006_v14  ;;  %2393 = vmatprep.subr.bf16.mxu0 %v4011_v36  ;;  %v4095_v14 = vld [vmem:[#allocation11 + $0x46c] ss:$16 sps:$4 sm:$0xff]  }
 0x267   :  { %2434 = vmatprep.subr.bf16.mxu1 %v4014_v16  ;;  %v4098_v36 = vld [vmem:[#allocation11 + $0x66c] ss:$16 sps:$4 sm:$0xff]   ;;  %v4096_v16 = vld [vmem:[#allocation11 + $0x668] ss:$16 sps:$4 sm:$0xff]  }
 0x269   :  { %2394 = vmatpush1.bf16.msra.mxu0 %v4009_v59  ;;  %v4101_v59 = vld [vmem:[#allocation11 + $0x44c] ss:$16 sps:$4 sm:$0xff]  }
 0x26a   :  { %2435 = vmatpush1.bf16.msra.mxu1 %v4012_v17  ;;  %2395 = vmatprep.subr.bf16.mxu0 %v4017_v13  ;;  %v4104_v17 = vld [vmem:[#allocation11 + $0x64c] ss:$16 sps:$4 sm:$0xff]   ;;  %v4099_v13 = vld [vmem:[#allocation11 + $0x448] ss:$16 sps:$4 sm:$0xff]  }
 0x26b   :  { %2436 = vmatprep.subr.bf16.mxu1 %v4020_v18  ;;  %v4102_v18 = vld [vmem:[#allocation11 + $0x648] ss:$16 sps:$4 sm:$0xff]  }
 0x26d   :  { %2396 = vmatpush1.bf16.msra.mxu0 %v4015_v63  ;;  %v4107_v63 = vld [vmem:[#allocation11 + $0x42c] ss:$16 sps:$4 sm:$0xff]  }
 0x26e   :  { %2437 = vmatpush1.bf16.msra.mxu1 %v4018_v19  ;;  %2397 = vmatprep.subr.bf16.mxu0 %v4023_v0  ;;  %v4110_v19 = vld [vmem:[#allocation11 + $0x62c] ss:$16 sps:$4 sm:$0xff]   ;;  %v4105_v0 = vld [vmem:[#allocation11 + $0x428] ss:$16 sps:$4 sm:$0xff]  }
 0x26f   :  { %2438 = vmatprep.subr.bf16.mxu1 %v4026_v21  ;;  %v4108_v21 = vld [vmem:[#allocation11 + $0x628] ss:$16 sps:$4 sm:$0xff]  }
 0x271   :  { %2398 = vmatpush2.bf16.msra.mxu0 %v4021_v22  ;;  %v4113_v22 = vld [vmem:[#allocation11 + $0x40c] ss:$16 sps:$4 sm:$0xff]  }
 0x272   :  { %2439 = vmatpush2.bf16.msra.mxu1 %v4024_v29  ;;  %2399 = vmatprep.subr.bf16.mxu0 %v4029_v23  ;;  %v4116_v29 = vld [vmem:[#allocation11 + $0x60c] ss:$16 sps:$4 sm:$0xff]   ;;  %v4111_v23 = vld [vmem:[#allocation11 + $0x408] ss:$16 sps:$4 sm:$0xff]  }
 0x273   :  { %2440 = vmatprep.subr.bf16.mxu1 %v4032_v46  ;;  %v4114_v46 = vld [vmem:[#allocation11 + $0x608] ss:$16 sps:$4 sm:$0xff]  }
 0x275   :  { %2400 = vmatpush2.bf16.msra.mxu0 %v4027_v25  ;;  %v4119_v25 = vld [vmem:[#allocation11 + $0x5ec] ss:$16 sps:$4 sm:$0xff]  }
 0x276   :  { %2441 = vmatpush2.bf16.msra.mxu1 %v4030_v20  ;;  %2401 = vmatprep.subr.bf16.mxu0 %v4035_v26  ;;  %v4122_v20 = vld [vmem:[#allocation11 + $0x7ec] ss:$16 sps:$4 sm:$0xff]   ;;  %v4117_v26 = vld [vmem:[#allocation11 + $0x5e8] ss:$16 sps:$4 sm:$0xff]  }
 0x277   :  { %2442 = vmatprep.subr.bf16.mxu1 %v4038_v39  ;;  %v4120_v39 = vld [vmem:[#allocation11 + $0x7e8] ss:$16 sps:$4 sm:$0xff]  }
 0x279   :  { %2402 = vmatpush2.bf16.msra.mxu0 %v4033_v27  ;;  %v4125_v27 = vld [vmem:[#allocation11 + $0x5cc] ss:$16 sps:$4 sm:$0xff]  }
 0x27a   :  { %2443 = vmatpush2.bf16.msra.mxu1 %v4036_v30  ;;  %2403 = vmatprep.subr.bf16.mxu0 %v4041_v35  ;;  %v4128_v30 = vld [vmem:[#allocation11 + $0x7cc] ss:$16 sps:$4 sm:$0xff]   ;;  %v4123_v35 = vld [vmem:[#allocation11 + $0x5c8] ss:$16 sps:$4 sm:$0xff]  }
 0x27b   :  { %2444 = vmatprep.subr.bf16.mxu1 %v4044_v37  ;;  %v4126_v37 = vld [vmem:[#allocation11 + $0x7c8] ss:$16 sps:$4 sm:$0xff]  }
 0x27d   :  { %2404 = vmatpush2.bf16.msra.mxu0 %v4039_v42  ;;  %v4131_v42 = vld [vmem:[#allocation11 + $0x5ac] ss:$16 sps:$4 sm:$0xff]  }
 0x27e   :  { %2445 = vmatpush2.bf16.msra.mxu1 %v4042_v43  ;;  %2405 = vmatprep.subr.bf16.mxu0 %v4047_v47  ;;  %v4134_v43 = vld [vmem:[#allocation11 + $0x7ac] ss:$16 sps:$4 sm:$0xff]   ;;  %v4129_v47 = vld [vmem:[#allocation11 + $0x5a8] ss:$16 sps:$4 sm:$0xff]  }
 0x27f   :  { %2446 = vmatprep.subr.bf16.mxu1 %v4050_v48  ;;  %v4132_v48 = vld [vmem:[#allocation11 + $0x7a8] ss:$16 sps:$4 sm:$0xff]  }
 0x281   :  { %2406 = vmatpush2.bf16.msra.mxu0 %v4045_v49  ;;  %v4137_v49 = vld [vmem:[#allocation11 + $0x58c] ss:$16 sps:$4 sm:$0xff]  }
 0x282   :  { %2447 = vmatpush2.bf16.msra.mxu1 %v4048_v50  ;;  %2407 = vmatprep.subr.bf16.mxu0 %v4053_v51  ;;  %v4140_v50 = vld [vmem:[#allocation11 + $0x78c] ss:$16 sps:$4 sm:$0xff]   ;;  %v4135_v51 = vld [vmem:[#allocation11 + $0x588] ss:$16 sps:$4 sm:$0xff]  }
 0x283   :  { %2448 = vmatprep.subr.bf16.mxu1 %v4056_v52  ;;  %v4138_v52 = vld [vmem:[#allocation11 + $0x788] ss:$16 sps:$4 sm:$0xff]  }
 0x285   :  { %2408 = vmatpush2.bf16.msra.mxu0 %v4051_v53  ;;  %v4143_v53 = vld [vmem:[#allocation11 + $0x56c] ss:$16 sps:$4 sm:$0xff]  }
 0x286   :  { %2449 = vmatpush2.bf16.msra.mxu1 %v4054_v54  ;;  %2409 = vmatprep.subr.bf16.mxu0 %v4059_v55  ;;  %v4146_v54 = vld [vmem:[#allocation11 + $0x76c] ss:$16 sps:$4 sm:$0xff]   ;;  %v4141_v55 = vld [vmem:[#allocation11 + $0x568] ss:$16 sps:$4 sm:$0xff]  }
 0x287   :  { %2450 = vmatprep.subr.bf16.mxu1 %v4062_v58  ;;  %v4144_v58 = vld [vmem:[#allocation11 + $0x768] ss:$16 sps:$4 sm:$0xff]  }
 0x289   :  { %2410 = vmatpush2.bf16.msra.mxu0 %v4057_v60  ;;  %v4149_v60 = vld [vmem:[#allocation11 + $0x54c] ss:$16 sps:$4 sm:$0xff]  }
 0x28a   :  { %2451 = vmatpush2.bf16.msra.mxu1 %v4060_v61  ;;  %2411 = vmatprep.subr.bf16.mxu0 %v4065_v62  ;;  %v4152_v61 = vld [vmem:[#allocation11 + $0x74c] ss:$16 sps:$4 sm:$0xff]   ;;  %v4147_v62 = vld [vmem:[#allocation11 + $0x548] ss:$16 sps:$4 sm:$0xff]  }
 0x28b   :  { %2452 = vmatprep.subr.bf16.mxu1 %v4068_v31  ;;  %v4150_v31 = vld [vmem:[#allocation11 + $0x748] ss:$16 sps:$4 sm:$0xff]  }
 0x28d   :  { %2412 = vmatpush2.bf16.msra.mxu0 %v4063_v1  ;;  %v4155_v1 = vld [vmem:[#allocation11 + $0x52c] ss:$16 sps:$4 sm:$0xff]  }
 0x28e   :  { %2453 = vmatpush2.bf16.msra.mxu1 %v4066_v32  ;;  %2463 = vmatprep.subr.bf16.mxu0 %v4071_v2  ;;  %v4158_v32 = vld [vmem:[#allocation11 + $0x72c] ss:$16 sps:$4 sm:$0xff]   ;;  %v4153_v2 = vld [vmem:[#allocation11 + $0x528] ss:$16 sps:$4 sm:$0xff]  }
 0x28f   :  { %2504 = vmatprep.subr.bf16.mxu1 %v4074_v3  ;;  %v4156_v3 = vld [vmem:[#allocation11 + $0x728] ss:$16 sps:$4 sm:$0xff]  }
 0x290   :  { %2414 = vmatmul.mubr.bf16.vlgmr.msra.gmra.mxu0 %v4725_v38  ;;  %v4084_v38 = vld [vmem:[#allocation11 + $0x6a8] ss:$16 sps:$4 sm:$0xff]  }
 0x291   :  { %2455 = vmatmul.mubr.bf16.vlgmr.msra.gmra.mxu1 %v4727_v40  ;;  %2464 = vmatpush1.bf16.msra.mxu0 %v4069_v4  ;;  %v4092_v40 = vld [vmem:[#allocation11 + $0x68c] ss:$16 sps:$4 sm:$0xff]  }
 0x292   :  { %2495 = vmatprep.mubr.bf16.mxu0 %v4733_v44  ;;  %2505 = vmatpush1.bf16.msra.mxu1 %v4072_v6  ;;  %v4090_v44 = vld [vmem:[#allocation11 + $0x688] ss:$16 sps:$4 sm:$0xff]   ;;  %v4161_v4 = vld [vmem:[#allocation11 + $0x50c] ss:$16 sps:$4 sm:$0xff]  }
 0x293   :  { %2536 = vmatprep.mubr.bf16.mxu1 %v4735_v45  ;;  %2465 = vmatprep.subr.bf16.mxu0 %v4077_v8  ;;  %v4093_v45 = vld [vmem:[#allocation11 + $0x468] ss:$16 sps:$4 sm:$0xff]   ;;  %v4164_v6 = vld [vmem:[#allocation11 + $0x70c] ss:$16 sps:$4 sm:$0xff]  }
 0x294   :  { %2506 = vmatprep.subr.bf16.mxu1 %v4080_v33  ;;  %v4159_v8 = vld [vmem:[#allocation11 + $0x508] ss:$16 sps:$4 sm:$0xff]  }
 0x295   :  { %2466 = vmatpush1.bf16.msra.mxu0 %v4075_v9  ;;  %v4162_v33 = vld [vmem:[#allocation11 + $0x708] ss:$16 sps:$4 sm:$0xff]   ;;  %v4758_v9 = vld [vmem:[%s4843_s6] sm:$0xf] }
 0x296   :  { %2507 = vmatpush1.bf16.msra.mxu1 %v4078_v34  ;;  %2467 = vmatprep.subr.bf16.mxu0 %v4083_v10  ;;  %v920_v34 = vrot.slane %v4758_v9, %v4629_v5  ;;  %v924_v10 = vrot.slane %v4758_v9, %v4631_v7 }
 0x297   :  { %2508 = vmatprep.subr.bf16.mxu1 %v4086_v12 }
 0x299   :  { %2468 = vmatpush1.bf16.msra.mxu0 %v4081_v28 }
 0x29a   :  { %2509 = vmatpush1.bf16.msra.mxu1 %v4084_v38  ;;  %2469 = vmatprep.subr.bf16.mxu0 %v4089_v41 }
 0x29b   :  { %2510 = vmatprep.subr.bf16.mxu1 %v4092_v40 }
 0x29d   :  { %2470 = vmatpush1.bf16.msra.mxu0 %v4087_v24 }
 0x29e   :  { %2511 = vmatpush1.bf16.msra.mxu1 %v4090_v44  ;;  %2471 = vmatprep.subr.bf16.mxu0 %v4095_v14 }
 0x29f   :  { %2512 = vmatprep.subr.bf16.mxu1 %v4098_v36 }
 0x2a1   :  { %2472 = vmatpush1.bf16.msra.mxu0 %v4093_v45 }
 0x2a2   :  { %2513 = vmatpush1.bf16.msra.mxu1 %v4096_v16  ;;  %2473 = vmatprep.subr.bf16.mxu0 %v4101_v59 }
 0x2a3   :  { %2514 = vmatprep.subr.bf16.mxu1 %v4104_v17 }
 0x2a5   :  { %2474 = vmatpush1.bf16.msra.mxu0 %v4099_v13 }
 0x2a6   :  { %2515 = vmatpush1.bf16.msra.mxu1 %v4102_v18  ;;  %2475 = vmatprep.subr.bf16.mxu0 %v4107_v63 }
 0x2a7   :  { %2516 = vmatprep.subr.bf16.mxu1 %v4110_v19 }
 0x2a9   :  { %2476 = vmatpush1.bf16.msra.mxu0 %v4105_v0 }
 0x2aa   :  { %2517 = vmatpush1.bf16.msra.mxu1 %v4108_v21  ;;  %2477 = vmatprep.subr.bf16.mxu0 %v4113_v22 }
 0x2ab   :  { %2518 = vmatprep.subr.bf16.mxu1 %v4116_v29 }
 0x2ad   :  { %2478 = vmatpush1.bf16.msra.mxu0 %v4111_v23 }
 0x2ae   :  { %2519 = vmatpush1.bf16.msra.mxu1 %v4114_v46  ;;  %2479 = vmatprep.subr.bf16.mxu0 %v4119_v25  ;;  %v4165_v46 = vld [vmem:[#allocation13 + $0x70] ss:$8 sps:$4 sm:$0xff]   ;;  %v4167_v25 = vld [vmem:[#allocation13 + $0x74] ss:$8 sps:$4 sm:$0xff]  }
 0x2af   :  { %2520 = vmatprep.subr.bf16.mxu1 %v4122_v20  ;;  %v4168_v20 = vld [vmem:[#allocation13 + $0x170] ss:$8 sps:$4 sm:$0xff]  }
 0x2b1   :  { %2480 = vmatpush2.bf16.msra.mxu0 %v4117_v26  ;;  %v4170_v26 = vld [vmem:[#allocation13 + $0x174] ss:$8 sps:$4 sm:$0xff]  }
 0x2b2   :  { %2521 = vmatpush2.bf16.msra.mxu1 %v4120_v39  ;;  %2481 = vmatprep.subr.bf16.mxu0 %v4125_v27  ;;  %v4173_v39 = vld [vmem:[#allocation13 + $0x64] ss:$8 sps:$4 sm:$0xff]  }
 0x2b3   :  { %2522 = vmatprep.subr.bf16.mxu1 %v4128_v30  ;;  %v4176_v27 = vld [vmem:[#allocation13 + $0x164] ss:$8 sps:$4 sm:$0xff]   ;;  %v4171_v30 = vld [vmem:[#allocation13 + $0x60] ss:$8 sps:$4 sm:$0xff]  }
 0x2b5   :  { %2482 = vmatpush2.bf16.msra.mxu0 %v4123_v35  ;;  %v4174_v35 = vld [vmem:[#allocation13 + $0x160] ss:$8 sps:$4 sm:$0xff]  }
 0x2b6   :  { %2523 = vmatpush2.bf16.msra.mxu1 %v4126_v37  ;;  %2483 = vmatprep.subr.bf16.mxu0 %v4131_v42  ;;  %v4179_v37 = vld [vmem:[#allocation13 + $0x54] ss:$8 sps:$4 sm:$0xff]  }
 0x2b7   :  { %2524 = vmatprep.subr.bf16.mxu1 %v4134_v43  ;;  %v4182_v42 = vld [vmem:[#allocation13 + $0x154] ss:$8 sps:$4 sm:$0xff]   ;;  %v4177_v43 = vld [vmem:[#allocation13 + $0x50] ss:$8 sps:$4 sm:$0xff]  }
 0x2b9   :  { %2484 = vmatpush2.bf16.msra.mxu0 %v4129_v47  ;;  %v4180_v47 = vld [vmem:[#allocation13 + $0x150] ss:$8 sps:$4 sm:$0xff]  }
 0x2ba   :  { %2525 = vmatpush2.bf16.msra.mxu1 %v4132_v48  ;;  %2485 = vmatprep.subr.bf16.mxu0 %v4137_v49  ;;  %v4185_v48 = vld [vmem:[#allocation13 + $0x44] ss:$8 sps:$4 sm:$0xff]  }
 0x2bb   :  { %2526 = vmatprep.subr.bf16.mxu1 %v4140_v50  ;;  %v4188_v49 = vld [vmem:[#allocation13 + $0x144] ss:$8 sps:$4 sm:$0xff]   ;;  %v4183_v50 = vld [vmem:[#allocation13 + $0x40] ss:$8 sps:$4 sm:$0xff]  }
 0x2bd   :  { %2486 = vmatpush2.bf16.msra.mxu0 %v4135_v51  ;;  %v4186_v51 = vld [vmem:[#allocation13 + $0x140] ss:$8 sps:$4 sm:$0xff]  }
 0x2be   :  { %2527 = vmatpush2.bf16.msra.mxu1 %v4138_v52  ;;  %2487 = vmatprep.subr.bf16.mxu0 %v4143_v53  ;;  %v4191_v52 = vld [vmem:[#allocation13 + $0x34] ss:$8 sps:$4 sm:$0xff]  }
 0x2bf   :  { %2528 = vmatprep.subr.bf16.mxu1 %v4146_v54  ;;  %v4194_v53 = vld [vmem:[#allocation13 + $0x134] ss:$8 sps:$4 sm:$0xff]   ;;  %v4189_v54 = vld [vmem:[#allocation13 + $0x30] ss:$8 sps:$4 sm:$0xff]  }
 0x2c1   :  { %2488 = vmatpush2.bf16.msra.mxu0 %v4141_v55  ;;  %v4192_v55 = vld [vmem:[#allocation13 + $0x130] ss:$8 sps:$4 sm:$0xff]  }
 0x2c2   :  { %2529 = vmatpush2.bf16.msra.mxu1 %v4144_v58  ;;  %2489 = vmatprep.subr.bf16.mxu0 %v4149_v60  ;;  %v4197_v58 = vld [vmem:[#allocation13 + $0x24] ss:$8 sps:$4 sm:$0xff]  }
 0x2c3   :  { %2530 = vmatprep.subr.bf16.mxu1 %v4152_v61  ;;  %v4200_v60 = vld [vmem:[#allocation13 + $0x124] ss:$8 sps:$4 sm:$0xff]   ;;  %v4195_v61 = vld [vmem:[#allocation13 + $0x20] ss:$8 sps:$4 sm:$0xff]  }
 0x2c5   :  { %2490 = vmatpush2.bf16.msra.mxu0 %v4147_v62  ;;  %v4198_v62 = vld [vmem:[#allocation13 + $0x120] ss:$8 sps:$4 sm:$0xff]  }
 0x2c6   :  { %2531 = vmatpush2.bf16.msra.mxu1 %v4150_v31  ;;  %2491 = vmatprep.subr.bf16.mxu0 %v4155_v1  ;;  %v4203_v31 = vld [vmem:[#allocation13 + $0x14] ss:$8 sps:$4 sm:$0xff]  }
 0x2c7   :  { %2532 = vmatprep.subr.bf16.mxu1 %v4158_v32  ;;  %v4206_v1 = vld [vmem:[#allocation13 + $0x114] ss:$8 sps:$4 sm:$0xff]   ;;  %v4201_v32 = vld [vmem:[#allocation13 + $0x10] ss:$8 sps:$4 sm:$0xff]  }
 0x2c9   :  { %2492 = vmatpush2.bf16.msra.mxu0 %v4153_v2  ;;  %v4204_v2 = vld [vmem:[#allocation13 + $0x110] ss:$8 sps:$4 sm:$0xff]  }
 0x2ca   :  { %2533 = vmatpush2.bf16.msra.mxu1 %v4156_v3  ;;  %2493 = vmatprep.subr.bf16.mxu0 %v4161_v4  ;;  %v4209_v3 = vld [vmem:[#allocation13 + $0x4] ss:$8 sps:$4 sm:$0xff]  }
 0x2cb   :  { %2534 = vmatprep.subr.bf16.mxu1 %v4164_v6  ;;  %v4212_v4 = vld [vmem:[#allocation13 + $0x104] ss:$8 sps:$4 sm:$0xff]   ;;  %v4207_v6 = vld [vmem:[#allocation13] ss:$8 sps:$4 sm:$0xff]  }
 0x2cd   :  { %2494 = vmatpush2.bf16.msra.mxu0 %v4159_v8  ;;  %v4210_v8 = vld [vmem:[#allocation13 + $0x100] ss:$8 sps:$4 sm:$0xff]  }
 0x2ce   :  { %2535 = vmatpush2.bf16.msra.mxu1 %v4162_v33  ;;  %3047 = vmatprep.subr.bf16.mxu0 %v4167_v25 }
 0x2cf   :  { %3088 = vmatprep.subr.bf16.mxu1 %v4170_v26 }
 0x2d0   :  { %2496 = vmatmul.mubr.bf16.vlgmr.msra.gmra.mxu0 %v4741_v56  ;;  %v2251_v12 = vpop.f32.mrf.mxu0  ;;  %v2292_v28 = vpop.f32.mrf.mxu1 }
 0x2d1   :  { %2537 = vmatmul.mubr.bf16.vlgmr.msra.gmra.mxu1 %v4745_v57  ;;  %v2252_v38 = vadd.f32 %v2251_v12, %v920_v34  ;;  %3048 = vmatpush1.bf16.msra.mxu0 %v4165_v46 }
 0x2d2   :  { %v2253_v41 = vpop.f32.mrf.mxu0  ;;  %v2294_v40 = vpop.f32.mrf.mxu1  ;;  %3089 = vmatpush1.bf16.msra.mxu1 %v4168_v20  ;;  %3049 = vmatprep.subr.bf16.mxu0 %v4173_v39 }
 0x2d3   :  { %v2293_v24 = vadd.f32 %v2292_v28, %v2252_v38  ;;  %v2254_v44 = vadd.f32 %v2253_v41, %v924_v10  ;;  %3090 = vmatprep.subr.bf16.mxu1 %v4176_v27 }
 0x2d4   :  { %v2255_v14 = vpop.f32.mrf.mxu0  ;;  %v2296_v36 = vpop.f32.mrf.mxu1 }
 0x2d5   :  { %v2295_v45 = vadd.f32 %v2294_v40, %v2254_v44  ;;  %3050 = vmatpush1.bf16.msra.mxu0 %v4171_v30  ;;  %v932_v14 = vrot.slane %v4758_v9, %v4637_v15 }
 0x2d6   :  { %v2256_v16 = vpop.f32.mrf.mxu0  ;;  %v2297_v59 = vpop.f32.mrf.mxu1  ;;  %3091 = vmatpush1.bf16.msra.mxu1 %v4174_v35  ;;  %3051 = vmatprep.subr.bf16.mxu0 %v4179_v37 }
 0x2d7   :  { %3092 = vmatprep.subr.bf16.mxu1 %v4182_v42 }
 0x2d9   :  { %3052 = vmatpush1.bf16.msra.mxu0 %v4177_v43 }
 0x2da   :  { %3093 = vmatpush1.bf16.msra.mxu1 %v4180_v47  ;;  %3053 = vmatprep.subr.bf16.mxu0 %v4185_v48 }
 0x2db   :  { %3094 = vmatprep.subr.bf16.mxu1 %v4188_v49 }
 0x2dd   :  { %3054 = vmatpush1.bf16.msra.mxu0 %v4183_v50 }
 0x2de   :  { %3095 = vmatpush1.bf16.msra.mxu1 %v4186_v51  ;;  %3055 = vmatprep.subr.bf16.mxu0 %v4191_v52 }
 0x2df   :  { %3096 = vmatprep.subr.bf16.mxu1 %v4194_v53 }
 0x2e1   :  { %3056 = vmatpush1.bf16.msra.mxu0 %v4189_v54 }
 0x2e2   :  { %3097 = vmatpush1.bf16.msra.mxu1 %v4192_v55  ;;  %3057 = vmatprep.subr.bf16.mxu0 %v4197_v58 }
 0x2e3   :  { %3098 = vmatprep.subr.bf16.mxu1 %v4200_v60 }
 0x2e5   :  { %3058 = vmatpush1.bf16.msra.mxu0 %v4195_v61 }
 0x2e6   :  { %3099 = vmatpush1.bf16.msra.mxu1 %v4198_v62  ;;  %3059 = vmatprep.subr.bf16.mxu0 %v4203_v31 }
 0x2e7   :  { %3100 = vmatprep.subr.bf16.mxu1 %v4206_v1 }
 0x2e9   :  { %3060 = vmatpush1.bf16.msra.mxu0 %v4201_v32 }
 0x2ea   :  { %3101 = vmatpush1.bf16.msra.mxu1 %v4204_v2  ;;  %3061 = vmatprep.subr.bf16.mxu0 %v4209_v3  ;;  %v4213_v3 = vld [vmem:[#allocation13 + $0xf0] ss:$8 sps:$4 sm:$0xff]  }
 0x2eb   :  { %3102 = vmatprep.subr.bf16.mxu1 %v4212_v4  ;;  %v4215_v4 = vld [vmem:[#allocation13 + $0xf4] ss:$8 sps:$4 sm:$0xff]  }
 0x2ed   :  { %3062 = vmatpush1.bf16.msra.mxu0 %v4207_v6  ;;  %v4216_v6 = vld [vmem:[#allocation13 + $0x1f0] ss:$8 sps:$4 sm:$0xff]  }
 0x2ee   :  { %3103 = vmatpush1.bf16.msra.mxu1 %v4210_v8  ;;  %v4218_v8 = vld [vmem:[#allocation13 + $0x1f4] ss:$8 sps:$4 sm:$0xff]   ;;  %3063 = vmatprep.subr.bf16.mxu0 %v4215_v4 }
 0x2ef   :  { %3104 = vmatprep.subr.bf16.mxu1 %v4218_v8 }
 0x2f1   :  { %3064 = vmatpush2.bf16.msra.mxu0 %v4213_v3 }
 0x2f2   :  { %3105 = vmatpush2.bf16.msra.mxu1 %v4216_v6 }
 0x310   :  { %v2333_v17 = vpop.f32.mrf.mxu0  ;;  %v2374_v13 = vpop.f32.mrf.mxu1 }
 0x311   :  { %v2334_v18 = vadd.f32 %v2333_v17, %v2293_v24  ;;  %v928_v24 = vrot.slane %v4758_v9, %v4635_v11 }
 0x312   :  { %v2335_v63 = vpop.f32.mrf.mxu0  ;;  %v2376_v19 = vpop.f32.mrf.mxu1 }
 0x313   :  { %v4766_v56 = vadd.f32 %v2374_v13, %v2334_v18  ;;  %v2336_v0 = vadd.f32 %v2335_v63, %v2295_v45 }
 0x314   :  { %v2337_v21 = vpop.f32.mrf.mxu0  ;;  %v2378_v57 = vpop.f32.mrf.mxu1 }
 0x315   :  { %v4768_v22 = vadd.f32 %v2376_v19, %v2336_v0  ;;  %v2549_v36 = vmul.f32 0.70710677, %v4766_v56  ;;  %v2545_v42 = vmul.f32 0.5, %v4766_v56 }
 0x316   :  { %v2338_v29 = vpop.f32.mrf.mxu0  ;;  %v2379_v23 = vpop.f32.mrf.mxu1 }
 0x317   :  { %v2550_v44 = vmul.f32 0.70710677, %v4768_v22  ;;  %v2546_v37 = vmul.f32 0.5, %v4768_v22 }
 0x319   :  { %4295 = verf.f32 %v2550_v44  ;;  %v4236_v44 = vld [vmem:[#allocation13 + $0x1c4] ss:$8 sps:$4 sm:$0xff]  }
 0x31a   :  { %4297 = verf.f32 %v2549_v36  ;;  %v4234_v36 = vld [vmem:[#allocation13 + $0x1c0] ss:$8 sps:$4 sm:$0xff]  }
 0x326   :  { %v4296_v39 = vpop.eup %4295 }
 0x327   :  { %v4298_v27 = vpop.eup %4297  ;;  %v2558_v30 = vadd.f32 1.0, %v4296_v39 }
 0x328   :  { %v2557_v35 = vadd.f32 1.0, %v4298_v27 }
 0x329   :  { %v4778_v43 = vmul.f32 %v2558_v30, %v2546_v37 }
 0x32a   :  { %v4780_v47 = vmul.f32 %v2557_v35, %v2545_v42 }
 0x32b   :  { %v2575_v51 = vmul.f32 %v4778_v43, %v4778_v43 }
 0x32c   :  { %v2574_v53 = vmul.f32 %v4780_v47, %v4780_v47  ;;  %v2567_v56 = vadd.f32 %v4778_v43, %v4780_v47 }
 0x32e   :  { %v2578_v62 = vadd.f32 %v2575_v51, %v2574_v53 }
 0x350   :  { %v2415_v33 = vpop.f32.mrf.mxu0 }
 0x351   :  { %v2456_v34 = vpop.f32.mrf.mxu1  ;;  %v2416_v45 = vadd.f32 %v2415_v33, %v928_v24  ;;  %v4221_v33 = vld [vmem:[#allocation13 + $0xe4] ss:$8 sps:$4 sm:$0xff]  }
 0x352   :  { %v2417_v10 = vpop.f32.mrf.mxu0  ;;  %3065 = vmatprep.subr.bf16.mxu0 %v4221_v33  ;;  %v4233_v24 = vld [vmem:[#allocation13 + $0xc4] ss:$8 sps:$4 sm:$0xff]  }
 0x353   :  { %v2458_v12 = vpop.f32.mrf.mxu1  ;;  %v2418_v16 = vadd.f32 %v2417_v10, %v932_v14  ;;  %v2457_v59 = vadd.f32 %v2456_v34, %v2416_v45  ;;  %v4224_v34 = vld [vmem:[#allocation13 + $0x1e4] ss:$8 sps:$4 sm:$0xff]   ;;  %v4219_v10 = vld [vmem:[#allocation13 + $0xe0] ss:$8 sps:$4 sm:$0xff]   ;;  %v4239_v45 = vld [vmem:[#allocation13 + $0xb4] ss:$8 sps:$4 sm:$0xff]  }
 0x354   :  { %v2419_v28 = vpop.f32.mrf.mxu0  ;;  %3106 = vmatprep.subr.bf16.mxu1 %v4224_v34  ;;  %3066 = vmatpush2.bf16.msra.mxu0 %v4219_v10  ;;  %v4231_v14 = vld [vmem:[#allocation13 + $0xc0] ss:$8 sps:$4 sm:$0xff]  }
 0x355   :  { %v2460_v38 = vpop.f32.mrf.mxu1  ;;  %v2459_v13 = vadd.f32 %v2458_v12, %v2418_v16  ;;  %v4222_v12 = vld [vmem:[#allocation13 + $0x1e0] ss:$8 sps:$4 sm:$0xff]   ;;  %v4227_v28 = vld [vmem:[#allocation13 + $0xd4] ss:$8 sps:$4 sm:$0xff]  }
 0x356   :  { %v2420_v41 = vpop.f32.mrf.mxu0  ;;  %3107 = vmatpush2.bf16.msra.mxu1 %v4222_v12  ;;  %v4230_v38 = vld [vmem:[#allocation13 + $0x1d4] ss:$8 sps:$4 sm:$0xff]   ;;  %3067 = vmatprep.subr.bf16.mxu0 %v4227_v28 }
 0x357   :  { %v2461_v40 = vpop.f32.mrf.mxu1  ;;  %v4225_v41 = vld [vmem:[#allocation13 + $0xd0] ss:$8 sps:$4 sm:$0xff]   ;;  %3108 = vmatprep.subr.bf16.mxu1 %v4230_v38  ;;  %v4242_v16 = vld [vmem:[#allocation13 + $0x1b4] ss:$8 sps:$4 sm:$0xff]  }
 0x358   :  { %v4228_v40 = vld [vmem:[#allocation13 + $0x1d0] ss:$8 sps:$4 sm:$0xff]   ;;  %3068 = vmatpush2.bf16.msra.mxu0 %v4225_v41 }
 0x359   :  { %3069 = vmatprep.subr.bf16.mxu0 %v4233_v24 }
 0x35a   :  { %3109 = vmatpush2.bf16.msra.mxu1 %v4228_v40 }
 0x35b   :  { %3110 = vmatprep.subr.bf16.mxu1 %v4236_v44 }
 0x35c   :  { %3070 = vmatpush2.bf16.msra.mxu0 %v4231_v14 }
 0x35d   :  { %3071 = vmatprep.subr.bf16.mxu0 %v4239_v45 }
 0x35e   :  { %3111 = vmatpush2.bf16.msra.mxu1 %v4234_v36 }
 0x35f   :  { %3112 = vmatprep.subr.bf16.mxu1 %v4242_v16 }
 0x390   :  { %v2497_v17 = vpop.f32.mrf.mxu0 }
 0x391   :  { %v2498_v18 = vadd.f32 %v2497_v17, %v2457_v59  ;;  %v2538_v63 = vpop.f32.mrf.mxu1  ;;  %v4237_v59 = vld [vmem:[#allocation13 + $0xb0] ss:$8 sps:$4 sm:$0xff]  }
 0x392   :  { %v2499_v19 = vpop.f32.mrf.mxu0  ;;  %v4240_v17 = vld [vmem:[#allocation13 + $0x1b0] ss:$8 sps:$4 sm:$0xff]   ;;  %3072 = vmatpush2.bf16.msra.mxu0 %v4237_v59 }
 0x393   :  { %v2539_v0 = vadd.f32 %v2538_v63, %v2498_v18  ;;  %v2500_v21 = vadd.f32 %v2499_v19, %v2459_v13  ;;  %v2540_v57 = vpop.f32.mrf.mxu1  ;;  %v4245_v13 = vld [vmem:[#allocation13 + $0xa4] ss:$8 sps:$4 sm:$0xff]   ;;  %3113 = vmatpush2.bf16.msra.mxu1 %v4240_v17  ;;  %v4243_v63 = vld [vmem:[#allocation13 + $0xa0] ss:$8 sps:$4 sm:$0xff]  }
 0x394   :  { %v2501_v29 = vpop.f32.mrf.mxu0  ;;  %v4248_v18 = vld [vmem:[#allocation13 + $0x1a4] ss:$8 sps:$4 sm:$0xff]   ;;  %v4246_v19 = vld [vmem:[#allocation13 + $0x1a0] ss:$8 sps:$4 sm:$0xff]   ;;  %3073 = vmatprep.subr.bf16.mxu0 %v4245_v13 }
 0x395   :  { %v2551_v23 = vmul.f32 0.70710677, %v2539_v0  ;;  %v2541_v46 = vadd.f32 %v2540_v57, %v2500_v21  ;;  %v2542_v25 = vpop.f32.mrf.mxu1  ;;  %v2547_v49 = vmul.f32 0.5, %v2539_v0  ;;  %3114 = vmatprep.subr.bf16.mxu1 %v4248_v18  ;;  %v4251_v0 = vld [vmem:[#allocation13 + $0x94] ss:$8 sps:$4 sm:$0xff]  }
 0x396   :  { %v2502_v9 = vpop.f32.mrf.mxu0  ;;  %v4254_v21 = vld [vmem:[#allocation13 + $0x194] ss:$8 sps:$4 sm:$0xff]   ;;  %3074 = vmatpush2.bf16.msra.mxu0 %v4243_v63  ;;  %v4249_v57 = vld [vmem:[#allocation13 + $0x90] ss:$8 sps:$4 sm:$0xff]   ;;  %v4255_v25 = vld [vmem:[#allocation13 + $0x80] ss:$8 sps:$4 sm:$0xff]  }
 0x397   :  { %4299 = verf.f32 %v2551_v23  ;;  %v2552_v20 = vmul.f32 0.70710677, %v2541_v46  ;;  %v2543_v26 = vpop.f32.mrf.mxu1  ;;  %v2548_v55 = vmul.f32 0.5, %v2541_v46  ;;  %3115 = vmatpush2.bf16.msra.mxu1 %v4246_v19  ;;  %v4252_v29 = vld [vmem:[#allocation13 + $0x190] ss:$8 sps:$4 sm:$0xff]   ;;  %3075 = vmatprep.subr.bf16.mxu0 %v4251_v0 }
 0x398   :  { %3116 = vmatprep.subr.bf16.mxu1 %v4254_v21  ;;  %v4257_v23 = vld [vmem:[#allocation13 + $0x84] ss:$8 sps:$4 sm:$0xff]   ;;  %v4258_v9 = vld [vmem:[#allocation13 + $0x180] ss:$8 sps:$4 sm:$0xff]  }
 0x399   :  { %4301 = verf.f32 %v2552_v20  ;;  %v4260_v46 = vld [vmem:[#allocation13 + $0x184] ss:$8 sps:$4 sm:$0xff]  }
 0x39a   :  { %3076 = vmatpush2.bf16.msra.mxu0 %v4249_v57 }
 0x39b   :  { %3117 = vmatpush2.bf16.msra.mxu1 %v4252_v29  ;;  %3077 = vmatprep.subr.bf16.mxu0 %v4257_v23 }
 0x39c   :  { %3118 = vmatprep.subr.bf16.mxu1 %v4260_v46 }
 0x39e   :  { %3078 = vmatpush2.bf16.msra.mxu0 %v4255_v25 }
 0x39f   :  { %3119 = vmatpush2.bf16.msra.mxu1 %v4258_v9 }
 0x3a4   :  { %v4300_v48 = vpop.eup %4299 }
 0x3a5   :  { %v2559_v50 = vadd.f32 1.0, %v4300_v48  ;;  %v2565_v48 = vld [vmem:[%s4844_s7] sm:$0xf] }
 0x3a6   :  { %v4302_v52 = vpop.eup %4301  ;;  %v2613_v51 = vrot.slane %v2565_v48, %v4637_v15  ;;  %v2609_v53 = vrot.slane %v2565_v48, %v4635_v11 }
 0x3a7   :  { %v4786_v54 = vmul.f32 %v2559_v50, %v2547_v49  ;;  %v2560_v22 = vadd.f32 1.0, %v4302_v52  ;;  %v2566_v49 = vld [vmem:[%s4845_s8] sm:$0xf]  ;;  %v2605_v50 = vrot.slane %v2565_v48, %v4631_v7  ;;  %v2601_v52 = vrot.slane %v2565_v48, %v4629_v5  ;;  %v4263_v48 = vld [vmem:[#allocation14 + $0x70] sm:$0xff]  }
 0x3a9   :  { %v4790_v58 = vmul.f32 %v2560_v22, %v2548_v55  ;;  %v2568_v60 = vadd.f32 %v2567_v56, %v4786_v54  ;;  %v2576_v61 = vmul.f32 %v4786_v54, %v4786_v54 }
 0x3ab   :  { %v2569_v31 = vadd.f32 %v2568_v60, %v4790_v58  ;;  %v2577_v1 = vmul.f32 %v4790_v58, %v4790_v58  ;;  %v2579_v32 = vadd.f32 %v2578_v62, %v2576_v61  ;;  %v2630_v62 = vrot.slane %v2566_v49, %v4631_v7 }
 0x3ad   :  { %2570 = vadd.xlane.f32.xlu1 %v2569_v31  ;;  %v2580_v2 = vadd.f32 %v2579_v32, %v2577_v1  ;;  %v2638_v31 = vrot.slane %v2566_v49, %v4637_v15  ;;  %v2626_v1 = vrot.slane %v2566_v49, %v4629_v5  ;;  %v2634_v32 = vrot.slane %v2566_v49, %v4635_v11  ;;  %v2715_v11 = vld [vmem:[%s4847_s10] sm:$0x3]  ;;  %v4264_v49 = vld [vmem:[#allocation14 + $0x30] sm:$0xff]  }
 0x3ae   :  { %v2720_v41 = vrot.slane %v2715_v11, %v4629_v5  ;;  %v2724_v40 = vrot.slane %v2715_v11, %v4631_v7 }
 0x3b1   :  { %2581 = vadd.xlane.f32.xlu1 %v2580_v2 }
 0x436   :  { %v2571_v20 = vpop.xlane.xlu1 %2570 }
 0x437   :  { %v2573_v26 = vmul.f32 0.001953125, %v2571_v20 }
 0x439   :  { %v2584_v27 = vmul.f32 %v2573_v26, %v2573_v26  ;;  %v2587_v55 = vsub.f32 %v4780_v47, %v2573_v26  ;;  %v2589_v22 = vsub.f32 %v4786_v54, %v2573_v26  ;;  %v2588_v56 = vsub.f32 %v4778_v43, %v2573_v26 }
 0x43a   :  { %v2582_v39 = vpop.xlane.xlu1 %2581  ;;  %v2590_v60 = vsub.f32 %v4790_v58, %v2573_v26 }
 0x43b   :  { %v2583_v30 = vmul.f32 0.001953125, %v2582_v39 }
 0x43d   :  { %v2585_v35 = vsub.f32 %v2583_v30, %v2584_v27 }
 0x43f   :  { %v2586_v37 = vmax.f32 %v2585_v35, 0.0 }
 0x441   :  { %v2591_v42 = vadd.f32 1e-05, %v2586_v37  ;;  %v4261_v37 = vld [vmem:[#allocation14 + $0x78] sm:$0xff]  }
 0x442   :  { %3741 = vmatprep.subr.bf16.mxu0 %v4261_v37 }
 0x443   :  { %4303 = vrsqrt.f32 %v2591_v42  ;;  %v4262_v42 = vld [vmem:[#allocation14 + $0x38] sm:$0xff]  }
 0x450   :  { %v4304_v61 = vpop.eup %4303 }
 0x451   :  { %v2594_v2 = vmul.f32 %v4304_v61, %v2588_v56  ;;  %v2596_v3 = vmul.f32 %v4304_v61, %v2590_v60  ;;  %v2593_v4 = vmul.f32 %v4304_v61, %v2587_v55  ;;  %v2595_v6 = vmul.f32 %v4304_v61, %v2589_v22  ;;  %v4269_v55 = vld [vmem:[#allocation14 + $0x58] sm:$0xff]   ;;  %v4271_v56 = vld [vmem:[#allocation14 + $0x50] sm:$0xff]   ;;  %v4273_v61 = vld [vmem:[#allocation14 + $0x48] sm:$0xff]  }
 0x452   :  { %v4270_v22 = vld [vmem:[#allocation14 + $0x18] sm:$0xff]   ;;  %v4272_v60 = vld [vmem:[#allocation14 + $0x10] sm:$0xff]  }
 0x453   :  { %v2619_v47 = vmul.f32 %v2605_v50, %v2594_v2  ;;  %v2621_v8 = vmul.f32 %v2613_v51, %v2596_v3  ;;  %v2618_v54 = vmul.f32 %v2601_v52, %v2593_v4  ;;  %v2620_v33 = vmul.f32 %v2609_v53, %v2595_v6  ;;  %v4265_v50 = vld [vmem:[#allocation14 + $0x68] sm:$0xff]   ;;  %v4267_v52 = vld [vmem:[#allocation14 + $0x60] sm:$0xff]  }
 0x454   :  { %v4266_v51 = vld [vmem:[#allocation14 + $0x28] sm:$0xff]   ;;  %v4268_v53 = vld [vmem:[#allocation14 + $0x20] sm:$0xff]  }
 0x455   :  { %v2644_v43 = vadd.f32 %v2630_v62, %v2619_v47  ;;  %v2646_v34 = vadd.f32 %v2638_v31, %v2621_v8  ;;  %v2643_v58 = vadd.f32 %v2626_v1, %v2618_v54  ;;  %v2645_v10 = vadd.f32 %v2634_v32, %v2620_v33  ;;  %v4274_v62 = vld [vmem:[#allocation14 + $0x8] sm:$0xff]   ;;  %v4275_v31 = vld [vmem:[#allocation14 + $0x40] sm:$0xff]  }
 0x456   :  { %v4276_v1 = vld [vmem:[#allocation14] sm:$0xff]  }
 0x457   :  { %v2648_v12 = vpack.c.bf16 %v2644_v43, %v2644_v43  ;;  %v2650_v28 = vpack.c.bf16 %v2646_v34, %v2646_v34  ;;  %v2647_v38 = vpack.c.bf16 %v2643_v58, %v2643_v58  ;;  %v2649_v15 = vpack.c.bf16 %v2645_v10, %v2645_v10  ;;  %v3139_v33 = vld [vmem:[%s4848_s11] sm:$0x3] }
 0x458   :  { %v3140_v43 = vld [vmem:[%s4849_s12] sm:$0x3]  ;;  %v3165_v10 = vrot.slane %v3139_v33, %v4629_v5 }
 0x459   :  { %3079 = vmatprep.mubr.bf16.mxu0 %v2648_v12  ;;  %3120 = vmatprep.mubr.bf16.mxu1 %v2650_v28  ;;  %v3169_v12 = vrot.slane %v3139_v33, %v4631_v7  ;;  %v3182_v11 = vrot.slane %v3140_v43, %v4631_v7 }
 0x45a   :  { %3080 = vmatmul.mubr.bf16.vlgmr.msra.gmra.mxu0 %v2647_v38  ;;  %3121 = vmatmul.mubr.bf16.vlgmr.msra.gmra.mxu1 %v2649_v15  ;;  %v3178_v15 = vrot.slane %v3140_v43, %v4629_v5 }
 0x45b   :  { %3742 = vmatpush3.bf16.msra.mxu0 %v4262_v42 }
 0x45c   :  { %3743 = vmatprep.subr.bf16.mxu0 %v4263_v48 }
 0x45f   :  { %3744 = vmatpush3.bf16.msra.mxu0 %v4264_v49 }
 0x460   :  { %3745 = vmatprep.subr.bf16.mxu0 %v4265_v50 }
 0x463   :  { %3746 = vmatpush3.bf16.msra.mxu0 %v4266_v51 }
 0x464   :  { %3747 = vmatprep.subr.bf16.mxu0 %v4267_v52 }
 0x467   :  { %3748 = vmatpush3.bf16.msra.mxu0 %v4268_v53 }
 0x468   :  { %3749 = vmatprep.subr.bf16.mxu0 %v4269_v55 }
 0x46b   :  { %3750 = vmatpush3.bf16.msra.mxu0 %v4270_v22 }
 0x46c   :  { %3751 = vmatprep.subr.bf16.mxu0 %v4271_v56 }
 0x46f   :  { %3752 = vmatpush3.bf16.msra.mxu0 %v4272_v60 }
 0x470   :  { %3753 = vmatprep.subr.bf16.mxu0 %v4273_v61 }
 0x473   :  { %3754 = vmatpush3.bf16.msra.mxu0 %v4274_v62 }
 0x474   :  { %3755 = vmatprep.subr.bf16.mxu0 %v4275_v31 }
 0x477   :  { %3756 = vmatpush3.bf16.msra.mxu0 %v4276_v1 }
 0x51a   :  { %v3081_v24 = vpop.f32.mrf.mxu0  ;;  %v3122_v44 = vpop.f32.mrf.mxu1 }
 0x51b   :  { %v3082_v14 = vadd.f32 %v3081_v24, %v2720_v41 }
 0x51c   :  { %v3083_v36 = vpop.f32.mrf.mxu0  ;;  %v3124_v45 = vpop.f32.mrf.mxu1 }
 0x51d   :  { %v3123_v16 = vadd.f32 %v3122_v44, %v3082_v14  ;;  %v3084_v59 = vadd.f32 %v3083_v36, %v2724_v40 }
 0x51e   :  { %v3085_v17 = vpop.f32.mrf.mxu0  ;;  %v3126_v13 = vpop.f32.mrf.mxu1 }
 0x51f   :  { %v3131_v18 = vmul.f32 0.70710677, %v3123_v16  ;;  %v3125_v63 = vadd.f32 %v3124_v45, %v3084_v59  ;;  %v3129_v29 = vmul.f32 0.5, %v3123_v16  ;;  %v3724_v59 = vld [vmem:[%s4851_s14] ss:$0 sm:$0xff] }
 0x520   :  { %v3086_v19 = vpop.f32.mrf.mxu0  ;;  %v3127_v0 = vpop.f32.mrf.mxu1 }
 0x521   :  { %4305 = verf.f32 %v3131_v18  ;;  %v3132_v21 = vmul.f32 0.70710677, %v3125_v63  ;;  %v3130_v9 = vmul.f32 0.5, %v3125_v63 }
 0x523   :  { %4307 = verf.f32 %v3132_v21 }
 0x52e   :  { %v4306_v57 = vpop.eup %4305 }
 0x52f   :  { %v3135_v23 = vadd.f32 1.0, %v4306_v57 }
 0x530   :  { %v4308_v46 = vpop.eup %4307 }
 0x531   :  { %v3137_v25 = vmul.f32 %v3135_v23, %v3129_v29  ;;  %v3136_v20 = vadd.f32 1.0, %v4308_v46 }
 0x533   :  { %v3138_v26 = vmul.f32 %v3136_v20, %v3130_v9  ;;  %v3146_v27 = vmul.f32 %v3137_v25, %v3137_v25 }
 0x535   :  { %v3141_v39 = vadd.f32 %v3138_v26, %v3137_v25  ;;  %v3147_v30 = vmul.f32 %v3138_v26, %v3138_v26 }
 0x537   :  { %3142 = vadd.xlane.f32.xlu0 %v3141_v39  ;;  %v3148_v35 = vadd.f32 %v3147_v30, %v3146_v27 }
 0x539   :  { %3149 = vadd.xlane.f32.xlu1 %v3148_v35 }
 0x5c0   :  { %v3143_v32 = vpop.xlane.xlu0 %3142 }
 0x5c1   :  { %v3145_v2 = vmul.f32 0.00390625, %v3143_v32 }
 0x5c2   :  { %v3150_v3 = vpop.xlane.xlu1 %3149 }
 0x5c3   :  { %v3151_v4 = vmul.f32 0.00390625, %v3150_v3  ;;  %v3152_v6 = vmul.f32 %v3145_v2, %v3145_v2  ;;  %v3155_v34 = vsub.f32 %v3137_v25, %v3145_v2  ;;  %v3156_v58 = vsub.f32 %v3138_v26, %v3145_v2 }
 0x5c5   :  { %v3153_v47 = vsub.f32 %v3151_v4, %v3152_v6 }
 0x5c7   :  { %v3154_v8 = vmax.f32 %v3153_v47, 0.0 }
 0x5c9   :  { %v3157_v54 = vadd.f32 1e-05, %v3154_v8 }
 0x5cb   :  { %4309 = vrsqrt.f32 %v3157_v54 }
 0x5d8   :  { %v4310_v28 = vpop.eup %4309 }
 0x5d9   :  { %v3160_v38 = vmul.f32 %v4310_v28, %v3156_v58  ;;  %v3159_v41 = vmul.f32 %v4310_v28, %v3155_v34 }
 0x5db   :  { %v3173_v40 = vmul.f32 %v3169_v12, %v3160_v38  ;;  %v3172_v24 = vmul.f32 %v3165_v10, %v3159_v41 }
 0x5dd   :  { %v3186_v44 = vadd.f32 %v3182_v11, %v3173_v40  ;;  %v3185_v14 = vadd.f32 %v3178_v15, %v3172_v24 }
 0x5df   :  { %v3188_v36 = vpack.c.bf16 %v3186_v44, %v3186_v44  ;;  %v3187_v45 = vpack.c.bf16 %v3185_v14, %v3185_v14 }
 0x5e1   :  { %3356 = vmatprep.mubr.bf16.mxu0 %v3188_v36 }
 0x5e2   :  { %3357 = vmatmul.mubr.bf16.vlgmr.msra.gmra.mxu0 %v3187_v45 }
 0x6a2   :  { %v3757_v16 = vpop.f32.mrf.mxu0 }
 0x6a4   :  { %v3758_v17 = vpop.f32.mrf.mxu0 }
 0x6a5   :  { %v3759_v5 = vadd.f32 %v3758_v17, %v3757_v16 }
 0x6a6   :  { %v3760_v13 = vpop.f32.mrf.mxu0 }
 0x6a7   :  { %v3359_v7 = vadd.f32 %v3759_v5, %v3724_v59 }
 0x6a8   :  { %v3761_v18 = vpop.f32.mrf.mxu0 }
 0x6a9   :  { %3364 = vst [vmem:[#allocation16] sm:$0xff] %v3359_v7 }
 0x6aa   :  { %4482 = shalt.err (!%p4479_p2)
}
 0x6ab   :  { %3374 = dma.vmem_to_hbm [thread:$0]  %s3372_s0, 128, %s4852_s15, [#allocation4]  }
 0x6ac   :  { %4501 = dma.done.wait [#allocation4], 128  }
 0x6ad   :  { %4502 = vsyncadd [#allocation4], 4294967168 }
 0x6ae   :  { %3378 = vsyncpa [#allocation3], 1 }
 0x6af   :  { %3379 = vsyncpa [#allocation6], 1 }
 0x6b0   :  { %3380 = vsyncpa [#allocation9], 1 }
 0x6b1   :  { %3381 = vsyncpa [#allocation12], 1 }
 0x6b2   :  { %3382 = vsyncpa [#allocation15], 1 }
 0x6b3   :  { %3383 = vsyncpa [#allocation4], 1 }

</bundles_post_ra>
